<compile_context>
chip_gen: v7x
topology: tpu7x:2x2x1
jax: 0.10.0
libtpu: 0.0.40
codegen_flags: <defaults>
</compile_context>

<pallas_src>
import jax
import jax.numpy as jnp
from jax.experimental import pallas as pl
from jax.experimental.pallas import tpu as pltpu

D_IN = 784
N_OUT = 10
N_PAD = 128  # internal lane-dense width for W^T / bias (MXU lane width)


def logreg_kernel(x_ref, wt_ref, b_ref, o_ref):
    # x_ref:  (TB, 784)   VMEM batch tile (streamed, double-buffered)
    # wt_ref: (784, 128)  VMEM resident W^T, zero-padded to 128 lanes
    # b_ref:  (1, 128)    VMEM resident bias, zero-padded
    # o_ref:  (TB, 10)    VMEM output tile (last dim == full array dim)
    logits = jnp.dot(
        x_ref[...], wt_ref[...],
        preferred_element_type=jnp.float32,
        precision=jax.lax.Precision.HIGHEST,   # true f32 multiply
    )
    logits = logits + b_ref[...]               # broadcast (1, 128)
    sig = jax.nn.sigmoid(logits)
    o_ref[...] = sig[:, :N_OUT].astype(o_ref.dtype)


def prepare_params(weight, bias):
    """One-time (per model) packing of Linear params: W^T / bias padded to 128 lanes."""
    wt = jnp.zeros((D_IN, N_PAD), jnp.float32).at[:, :N_OUT].set(
        weight.T.astype(jnp.float32))
    b2 = jnp.zeros((1, N_PAD), jnp.float32).at[:, :N_OUT].set(
        bias.reshape(1, N_OUT).astype(jnp.float32))
    return wt, b2


def logistic_regression(x, wt_padded, b_padded, *, tb_max=2048):
    """x: (B, 784) f32; wt_padded: (784, 128); b_padded: (1, 128) -> (B, 10) f32."""
    B, D = x.shape
    assert D == D_IN

    # Batch tile: multiple of 8 sublanes, capped at tb_max.  No padding of x:
    # the last grid step may be a partial block; Pallas drops the OOB rows on
    # writeback, so only rows < B ever reach HBM.
    TB = min(int(tb_max), max(8, ((B + 7) // 8) * 8))
    n_tiles = pl.cdiv(B, TB)

    # Scoped-VMEM request: double-buffered x tile (784 lanes pad to 896),
    # double-buffered output tile (10 lanes pad to 128), resident W^T + bias,
    # plus slack.  At TB=2048 this is ~21 MiB -> fits v7x's 64 MiB physical VMEM.
    x_buf = 2 * TB * 896 * 4
    o_buf = 2 * TB * N_PAD * 4
    w_res = 2 * (D_IN * N_PAD * 4 + N_PAD * 4)
    vmem_bytes = int(min(max(x_buf + o_buf + w_res + (4 << 20), 16 << 20), 96 << 20))

    out = pl.pallas_call(
        logreg_kernel,
        out_shape=jax.ShapeDtypeStruct((B, N_OUT), jnp.float32),
        grid_spec=pl.GridSpec(
            grid=(n_tiles,),
            in_specs=[
                pl.BlockSpec((TB, D_IN), lambda i: (i, 0)),     # stream x
                pl.BlockSpec((D_IN, N_PAD), lambda i: (0, 0)),  # resident W^T
                pl.BlockSpec((1, N_PAD), lambda i: (0, 0)),     # resident bias
            ],
            out_specs=pl.BlockSpec((TB, N_OUT), lambda i: (i, 0)),
        ),
        compiler_params=pltpu.CompilerParams(
            dimension_semantics=("parallel",),   # megacore batch sharding on v7x
            vmem_limit_bytes=vmem_bytes,
        ),
    )(x, wt_padded, b_padded)

    return out


if __name__ == "__main__":
    key = jax.random.PRNGKey(0)
    kx, kw, kb = jax.random.split(key, 3)

    # Small demo batch; 12 is not a multiple of 8, exercising the no-pad
    # partial-last-block path.
    B = 12
    x = jax.random.normal(kx, (B, D_IN), dtype=jnp.float32)

    # Deterministic init mirroring nn.Linear defaults (uniform(-1/sqrt(D), 1/sqrt(D))).
    bound = 1.0 / (D_IN ** 0.5)
    weight = jax.random.uniform(kw, (N_OUT, D_IN), minval=-bound, maxval=bound,
                                dtype=jnp.float32)
    bias = jax.random.uniform(kb, (N_OUT,), minval=-bound, maxval=bound,
                              dtype=jnp.float32)

    wt_padded, b_padded = prepare_params(weight, bias)   # hoisted, once per model
    out = logistic_regression(x, wt_padded, b_padded)
    jax.block_until_ready(out)

    # Reference check in plain JAX (f32 multiply to match the kernel).
    ref = jax.nn.sigmoid(
        jnp.dot(x, weight.T, precision=jax.lax.Precision.HIGHEST) + bias)
    assert out.shape == (B, N_OUT)
    assert jnp.allclose(out, ref, atol=1e-5, rtol=1e-5)

    print("KERNEL_OK")
</pallas_src>

<mosaic_0001>
module attributes {stable_mosaic.version = 11 : i64} {
  func.func @logreg_kernel(%arg0: i32, %arg1: memref<16x784xf32, #tpu.memory_space<vmem>>, %arg2: memref<784x128xf32, #tpu.memory_space<vmem>>, %arg3: memref<1x128xf32, #tpu.memory_space<vmem>>, %arg4: memref<16x10xf32, #tpu.memory_space<vmem>>) attributes {dimension_semantics = [#tpu.dimension_semantics<parallel>], iteration_bounds = array<i64: 1>, scalar_prefetch = 0 : i64, scratch_operands = 0 : i64, tpu.core_type = #tpu.core_type<tc>, window_params = [{transform_indices = @transform_0, window_bounds = array<i64: 16, 784>}, {pipeline_mode = #tpu.pipeline_mode<synchronous>, transform_indices = @transform_1, window_bounds = array<i64: 784, 128>}, {pipeline_mode = #tpu.pipeline_mode<synchronous>, transform_indices = @transform_2, window_bounds = array<i64: 1, 128>}, {transform_indices = @transform_3, window_bounds = array<i64: 16, 10>}]} {
    %c0 = arith.constant 0 : index
    %c0_0 = arith.constant 0 : index
    %0 = vector.load %arg1[%c0, %c0_0] : memref<16x784xf32, #tpu.memory_space<vmem>>, vector<16x784xf32>
    %c0_1 = arith.constant 0 : index
    %c0_2 = arith.constant 0 : index
    %1 = vector.load %arg2[%c0_1, %c0_2] : memref<784x128xf32, #tpu.memory_space<vmem>>, vector<784x128xf32>
    %cst = arith.constant dense<0.000000e+00> : vector<16x128xf32>
    %2 = tpu.matmul %0, %1, %cst {dimension_numbers = #tpu.dot_dimension_numbers<[1], [0], [0], [1], [0, 0, 1, 1], [], []>, precision = #tpu.contract_precision<fp32>} : vector<16x784xf32>, vector<784x128xf32>, vector<16x128xf32> -> vector<16x128xf32>
    %c0_3 = arith.constant 0 : index
    %c0_4 = arith.constant 0 : index
    %3 = vector.load %arg3[%c0_3, %c0_4] : memref<1x128xf32, #tpu.memory_space<vmem>>, vector<1x128xf32>
    %4 = vector.broadcast %3 : vector<1x128xf32> to vector<16x128xf32>
    %5 = arith.addf %2, %4 : vector<16x128xf32>
    %6 = arith.negf %5 : vector<16x128xf32>
    %7 = math.exp %6 : vector<16x128xf32>
    %cst_5 = arith.constant 1.000000e+00 : f32
    %8 = vector.broadcast %cst_5 : f32 to vector<16x128xf32>
    %9 = arith.addf %8, %7 : vector<16x128xf32>
    %10 = arith.divf %8, %9 : vector<16x128xf32>
    %11 = vector.extract_strided_slice %10 {offsets = [0, 0], sizes = [16, 10], strides = [1, 1]} : vector<16x128xf32> to vector<16x10xf32>
    %c0_6 = arith.constant 0 : index
    %c0_7 = arith.constant 0 : index
    %12 = vector.load %arg4[%c0_6, %c0_7] : memref<16x10xf32, #tpu.memory_space<vmem>>, vector<16x10xf32>
    tpu.vector_store %arg4[%c0_6, %c0_7], %11 {strides = array<i32>} : memref<16x10xf32, #tpu.memory_space<vmem>>, vector<16x10xf32>,
    return
  }
  func.func @transform_0(%arg0: i32) -> (i32, i32) {
    %c0_i32 = arith.constant 0 : i32
    %c0_i32_0 = arith.constant 0 : i32
    return %arg0, %c0_i32 : i32, i32
  }
  func.func @transform_1(%arg0: i32) -> (i32, i32) {
    %c0_i32 = arith.constant 0 : i32
    %c0_i32_0 = arith.constant 0 : i32
    %c0_i32_1 = arith.constant 0 : i32
    return %c0_i32, %c0_i32_0 : i32, i32
  }
  func.func @transform_2(%arg0: i32) -> (i32, i32) {
    %c0_i32 = arith.constant 0 : i32
    %c0_i32_0 = arith.constant 0 : i32
    %c0_i32_1 = arith.constant 0 : i32
    return %c0_i32, %c0_i32_0 : i32, i32
  }
  func.func @transform_3(%arg0: i32) -> (i32, i32) {
    %c0_i32 = arith.constant 0 : i32
    %c0_i32_0 = arith.constant 0 : i32
    return %arg0, %c0_i32 : i32, i32
  }
}

</mosaic_0001>

<bundles_post_ra>
// kernel: tpu_custom_call.1
= control target key start
LH: loop header
LB: loop body
LE: loop exit
PB: predicated region body
PF: predicated region fallthrough
CT: control target
= control target key end

     0   :  { %8 = vsyncpa [#allocation3], 0  ;;  %s6423_s0 = inlined_call_operand.hbm [shape: f32[12,784], index: 0, kind: input, shape index: {}]   ;;  %s6424_s1 = inlined_call_operand.hbm [shape: f32[784,128], index: 1, kind: input, shape index: {}]   ;;  %s6425_s2 = inlined_call_operand.vmem [shape: f32[1,128], index: 2, kind: input, shape index: {}]   ;;  %s6426_s3 = inlined_call_operand.hbm [shape: f32[12,10], index: 3, kind: output, shape index: {}]  }
   0x1   :  { %9 = vsyncpa [#allocation6], 0 }
   0x2   :  { %10 = vsyncpa [#allocation4], 0  ;;  %s4910_s12 = smov [#allocation2]   ;;  %s4838_s16 = scalar_lea.hbm %s6423_s0, 1792 }
   0x3   :  { %s16_s13 = sshll.u32 %s4910_s12, 4  ;;  %p4839_p0 = scmp.ne.s32.totalorder %s6423_s0, %s4838_s16  ;;  %s17_s13 = int_to_ptr.vmem [resolvable:$true] %s16_s13 }
   0x4   :  { %p4842_p1 = scmp.lt.u32.totalorder %s4838_s16, %s6423_s0 }
   0x6   :  { %p4844_p2 = pnand %p4842_p1, %p4839_p0 }
   0x8   :  { %4847 = shalt.err (!%p4844_p2)
}
   0x9   :  { %s4848_s21 = scalar_lea.vmem %s17_s13, 1792  ;;  %p4853_p4 = scmp.lt.s32.totalorder %s17_s13, %s17_s13 }
   0xa   :  { %p4849_p3 = scmp.ne.s32.totalorder %s17_s13, %s4848_s21  ;;  %p4854_p5 = scmp.lt.s32.totalorder %s4848_s21, %s4848_s21 }
   0xc   :  { %p4855_p6 = por %p4854_p5, %p4853_p4 }
   0xe   :  { %p4856_p7 = pnand %p4855_p6, %p4849_p3 }
  0x10   :  { %4859 = shalt.err (!%p4856_p7)
}
  0x11   :  { %s4911_s22 = smov 896   ;;  %s4912_s23 = smov 56  }
  0x12   :  { %22 = dma.hbm_to_vmem [thread:$0]  %s6423_s0, 1792, %s17_s13, [#allocation3], %s4911_s22, %s4911_s22, %s4912_s23  }
  0x13   :  { %s4913_s26 = smov [#allocation5]   ;;  %s4860_s30 = scalar_lea.hbm %s6424_s1, 12544 }
  0x14   :  { %s28_s27 = sshll.u32 %s4913_s26, 4  ;;  %p4861_p8 = scmp.ne.s32.totalorder %s6424_s1, %s4860_s30  ;;  %s29_s27 = int_to_ptr.vmem [resolvable:$true] %s28_s27 }
  0x15   :  { %p4864_p9 = scmp.lt.u32.totalorder %s4860_s30, %s6424_s1 }
  0x17   :  { %p4866_p10 = pnand %p4864_p9, %p4861_p8 }
  0x19   :  { %4869 = shalt.err (!%p4866_p10)
}
  0x1a   :  { %s4870_s8 = scalar_lea.vmem %s29_s27, 12544  ;;  %p4875_p12 = scmp.lt.s32.totalorder %s29_s27, %s29_s27 }
  0x1b   :  { %p4871_p11 = scmp.ne.s32.totalorder %s29_s27, %s4870_s8  ;;  %p4876_p13 = scmp.lt.s32.totalorder %s4870_s8, %s4870_s8 }
  0x1d   :  { %p4877_p0 = por %p4876_p13, %p4875_p12 }
  0x1f   :  { %p4878_p1 = pnand %p4877_p0, %p4871_p11 }
  0x21   :  { %4881 = shalt.err (!%p4878_p1)
}
  0x22   :  { %s4914_s0 = smov 128   ;;  %s4915_s9 = smov 8  }
  0x23   :  { %34 = dma.hbm_to_vmem [thread:$0]  %s6424_s1, 12544, %s29_s27, [#allocation6], %s4914_s0, %s4914_s0, %s4915_s9  }
  0x24   :  { %4904 = dma.done.wait [#allocation3], 1792  }
  0x25   :  { %4905 = vsyncadd [#allocation3], 4294965504 }
  0x26   :  { %4906 = dma.done.wait [#allocation6], 12544  }
  0x27   :  { %4907 = vsyncadd [#allocation6], 4294954752  ;;  %v73_v0 = vld [vmem:[#allocation5 + $0x80] sm:$0xff]  ;;  %v74_v1 = vld [vmem:[#allocation5 + $0x88] sm:$0xff]  ;;  %vm162_vm0 = vcmask 130048   ;;  %vm3437_vm1 = vcmask 80896  }
  0x28   :  { %v57_v2 = vld [vmem:[#allocation5] sm:$0xff]  ;;  %v218_v3 = vand.u32 4294901760, %v73_v0  ;;  %v221_v4 = vand.u32 4294901760, %v74_v1  ;;  %v58_v5 = vld [vmem:[#allocation5 + $0x8] sm:$0xff]  ;;  %v75_v7 = vld [vmem:[#allocation5 + $0x90] sm:$0xff] }
  0x29   :  { %v170_v6 = vand.u32 4294901760, %v57_v2  ;;  %v76_v8 = vld [vmem:[#allocation5 + $0x98] sm:$0xff]  ;;  %v173_v9 = vand.u32 4294901760, %v58_v5  ;;  %v224_v10 = vand.u32 4294901760, %v75_v7  ;;  %v59_v12 = vld [vmem:[#allocation5 + $0x10] sm:$0xff]  ;;  %v77_v18 = vld [vmem:[#allocation5 + $0xa0] sm:$0xff] }
  0x2a   :  { %v227_v11 = vand.u32 4294901760, %v76_v8  ;;  %v60_v13 = vld [vmem:[#allocation5 + $0x18] sm:$0xff]  ;;  %v4964_v14 = vpack.c.bf16 %v221_v4, %v218_v3  ;;  %v176_v16 = vand.u32 4294901760, %v59_v12  ;;  %v78_v19 = vld [vmem:[#allocation5 + $0xa8] sm:$0xff]  ;;  %v61_v23 = vld [vmem:[#allocation5 + $0x20] sm:$0xff]  ;;  %v230_v29 = vand.u32 4294901760, %v77_v18 }
  0x2b   :  { %v4966_v15 = vsub.f32 %v57_v2, %v170_v6  ;;  %v179_v17 = vand.u32 4294901760, %v60_v13  ;;  %v4968_v20 = vpack.c.bf16 %v173_v9, %v170_v6  ;;  %v4970_v21 = vsub.f32 %v58_v5, %v173_v9  ;;  %v62_v24 = vld [vmem:[#allocation5 + $0x28] sm:$0xff]  ;;  %v79_v37 = vld [vmem:[#allocation5 + $0xb0] sm:$0xff]  ;;  %v80_v42 = vld [vmem:[#allocation5 + $0xb8] sm:$0xff] }
  0x2c   :  { %v4972_v22 = vpack.c.bf16 %v227_v11, %v224_v10  ;;  %4212 = vmatprep.subr.bf16.mxu0 %v4964_v14  ;;  %v4975_v25 = vsub.f32 %v75_v7, %v224_v10  ;;  %v4977_v26 = vsub.f32 %v76_v8, %v227_v11  ;;  %v4981_v28 = vsub.f32 %v59_v12, %v176_v16  ;;  %v63_v55 = vld [vmem:[#allocation5 + $0x30] sm:$0xff]  ;;  %v64_v56 = vld [vmem:[#allocation5 + $0x38] sm:$0xff]  ;;  %v81_v5 = vld [vmem:[#allocation5 + $0xc0] sm:$0xff] }
  0x2d   :  { %v4979_v27 = vpack.c.bf16 %v179_v17, %v176_v16  ;;  %4214 = vmatpush3.bf16.msra.mxu0 %v4968_v20  ;;  %v233_v30 = vand.u32 4294901760, %v78_v19  ;;  %v4984_v31 = vsub.f32 %v73_v0, %v218_v3  ;;  %v4986_v32 = vsub.f32 %v74_v1, %v221_v4  ;;  %v82_v6 = vld [vmem:[#allocation5 + $0xc8] sm:$0xff]  ;;  %v65_v11 = vld [vmem:[#allocation5 + $0x40] sm:$0xff] }
  0x2e   :  { %4216 = vmatprep.subr.bf16.mxu0 %v4972_v22  ;;  %v182_v33 = vand.u32 4294901760, %v61_v23  ;;  %v185_v34 = vand.u32 4294901760, %v62_v24  ;;  %v6442_v35 = vand.u32 4294901760, %v4966_v15  ;;  %v6441_v36 = vand.u32 4294901760, %v4970_v21 }
  0x2f   :  { %v4991_v38 = vsub.f32 %v60_v13, %v179_v17  ;;  %v4993_v39 = vpack.c.bf16 %v233_v30, %v230_v29  ;;  %v4995_v40 = vsub.f32 %v77_v18, %v230_v29  ;;  %v6446_v41 = vand.u32 4294901760, %v4984_v31  ;;  %v66_v29 = vld [vmem:[#allocation5 + $0x48] sm:$0xff] }
  0x30   :  { %v4998_v43 = vsub.f32 %v78_v19, %v233_v30  ;;  %v6444_v44 = vand.u32 4294901760, %v4986_v32  ;;  %v5001_v45 = vpack.c.bf16 %v185_v34, %v182_v33  ;;  %v5003_v46 = vsub.f32 %v61_v23, %v182_v33 }
  0x31   :  { %4218 = vmatpush3.bf16.msra.mxu0 %v4979_v27  ;;  %v412_v47 = vsub.f32 %v4984_v31, %v6446_v41  ;;  %v300_v48 = vsub.f32 %v4966_v15, %v6442_v35  ;;  %v307_v49 = vsub.f32 %v4970_v21, %v6441_v36  ;;  %v236_v50 = vand.u32 4294901760, %v79_v37  ;;  %v44_v41 = vld [vmem:[#allocation2 + $0x8] sm:$0xff] }
  0x32   :  { %4220 = vmatprep.subr.bf16.mxu0 %v4993_v39  ;;  %v419_v51 = vsub.f32 %v4986_v32, %v6444_v44  ;;  %v239_v52 = vand.u32 4294901760, %v80_v42  ;;  %v6439_v53 = vand.u32 4294901760, %v4975_v25  ;;  %v6437_v54 = vand.u32 4294901760, %v4977_v26 }
  0x33   :  { %v413_v57 = vand.u32 4294901760, %v412_v47  ;;  %v5021_v58 = vsub.f32 %v62_v24, %v185_v34  ;;  %v301_v59 = vand.u32 4294901760, %v300_v48  ;;  %v308_v60 = vand.u32 4294901760, %v307_v49 }
  0x34   :  { %v420_v61 = vand.u32 4294901760, %v419_v51  ;;  %v5023_v62 = vpack.c.bf16 %v239_v52, %v236_v50  ;;  %v5025_v63 = vsub.f32 %v79_v37, %v236_v50  ;;  %v426_v0 = vsub.f32 %v4975_v25, %v6439_v53 }
  0x35   :  { %4222 = vmatpush3.bf16.msra.mxu0 %v5001_v45  ;;  %v4245_v1 = vpack.c.bf16 %v308_v60, %v301_v59  ;;  %v433_v2 = vsub.f32 %v4977_v26, %v6437_v54  ;;  %v188_v3 = vand.u32 4294901760, %v63_v55  ;;  %v191_v4 = vand.u32 4294901760, %v64_v56  ;;  %v84_v59 = vld [vmem:[#allocation5 + $0xd8] sm:$0xff] }
  0x36   :  { %v4243_v7 = vpack.c.bf16 %v420_v61, %v413_v57  ;;  %4224 = vmatprep.subr.bf16.mxu0 %v5023_v62  ;;  %v427_v8 = vand.u32 4294901760, %v426_v0  ;;  %v6436_v9 = vand.u32 4294901760, %v4981_v28  ;;  %v6434_v10 = vand.u32 4294901760, %v4991_v38  ;;  %v83_v57 = vld [vmem:[#allocation5 + $0xd0] sm:$0xff]  ;;  %v88_v54 = vld [vmem:[#allocation5 + $0xf8] sm:$0xff] }
  0x37   :  { %v5037_v12 = vsub.f32 %v80_v42, %v239_v52  ;;  %v434_v13 = vand.u32 4294901760, %v433_v2  ;;  %v5039_v16 = vpack.c.bf16 %v191_v4, %v188_v3  ;;  %v5041_v17 = vsub.f32 %v63_v55, %v188_v3 }
  0x38   :  { %4244 = vmatprep.subr.bf16.mxu1 %v4243_v7  ;;  %v314_v18 = vsub.f32 %v4981_v28, %v6436_v9  ;;  %v321_v19 = vsub.f32 %v4991_v38, %v6434_v10  ;;  %v242_v23 = vand.u32 4294901760, %v81_v5  ;;  %v245_v24 = vand.u32 4294901760, %v82_v6  ;;  %v87_v9 = vld [vmem:[#allocation5 + $0xf0] sm:$0xff] }
  0x39   :  { %4246 = vmatpush3.bf16.msra.mxu1 %v4245_v1  ;;  %v4247_v30 = vpack.c.bf16 %v434_v13, %v427_v8  ;;  %4226 = vmatpush3.bf16.msra.mxu0 %v5039_v16  ;;  %v6432_v33 = vand.u32 4294901760, %v4995_v40  ;;  %v6431_v34 = vand.u32 4294901760, %v4998_v43  ;;  %v194_v37 = vand.u32 4294901760, %v65_v11  ;;  %v67_v1 = vld [vmem:[#allocation5 + $0x50] sm:$0xff] }
  0x3a   :  { %v5052_v42 = vsub.f32 %v64_v56, %v191_v4  ;;  %v315_v47 = vand.u32 4294901760, %v314_v18  ;;  %v322_v48 = vand.u32 4294901760, %v321_v19  ;;  %v5054_v49 = vpack.c.bf16 %v245_v24, %v242_v23  ;;  %v68_v18 = vld [vmem:[#allocation5 + $0x58] sm:$0xff] }
  0x3b   :  { %4248 = vmatprep.subr.bf16.mxu1 %v4247_v30  ;;  %v5056_v50 = vsub.f32 %v81_v5, %v242_v23  ;;  %v440_v51 = vsub.f32 %v4995_v40, %v6432_v33  ;;  %v447_v52 = vsub.f32 %v4998_v43, %v6431_v34  ;;  %v197_v55 = vand.u32 4294901760, %v66_v29 }
  0x3c   :  { %v4249_v56 = vpack.c.bf16 %v322_v48, %v315_v47  ;;  %4228 = vmatprep.subr.bf16.mxu0 %v5054_v49  ;;  %v5065_v60 = vsub.f32 %v82_v6, %v245_v24  ;;  %v6429_v61 = vand.u32 4294901760, %v5003_v46  ;;  %v6427_v0 = vand.u32 4294901760, %v5021_v58 }
  0x3d   :  { %v441_v2 = vand.u32 4294901760, %v440_v51  ;;  %v448_v3 = vand.u32 4294901760, %v447_v52  ;;  %v5069_v4 = vpack.c.bf16 %v197_v55, %v194_v37  ;;  %v5071_v5 = vsub.f32 %v65_v11, %v194_v37 }
  0x3e   :  { %4250 = vmatpush3.bf16.msra.mxu1 %v4249_v56  ;;  %v328_v7 = vsub.f32 %v5003_v46, %v6429_v61  ;;  %v335_v6 = vsub.f32 %v5021_v58, %v6427_v0  ;;  %v248_v8 = vand.u32 4294901760, %v83_v57  ;;  %v251_v13 = vand.u32 4294901760, %v84_v59  ;;  %v86_v0 = vld [vmem:[#allocation5 + $0xe8] sm:$0xff] }
  0x3f   :  { %v4251_v19 = vpack.c.bf16 %v448_v3, %v441_v2  ;;  %4230 = vmatpush3.bf16.msra.mxu0 %v5069_v4  ;;  %v6428_v23 = vand.u32 4294901760, %v5025_v63  ;;  %v6430_v11 = vand.u32 4294901760, %v5037_v12  ;;  %v200_v24 = vand.u32 4294901760, %v67_v1  ;;  %v85_v3 = vld [vmem:[#allocation5 + $0xe0] sm:$0xff] }
  0x40   :  { %v5082_v30 = vsub.f32 %v66_v29, %v197_v55  ;;  %v329_v37 = vand.u32 4294901760, %v328_v7  ;;  %v336_v47 = vand.u32 4294901760, %v335_v6  ;;  %v5084_v48 = vpack.c.bf16 %v251_v13, %v248_v8  ;;  %v69_v6 = vld [vmem:[#allocation5 + $0x60] sm:$0xff] }
  0x41   :  { %4252 = vmatprep.subr.bf16.mxu1 %v4251_v19  ;;  %v5086_v51 = vsub.f32 %v83_v57, %v248_v8  ;;  %v454_v52 = vsub.f32 %v5025_v63, %v6428_v23  ;;  %v461_v56 = vsub.f32 %v5037_v12, %v6430_v11  ;;  %v203_v2 = vand.u32 4294901760, %v68_v18  ;;  %v70_v11 = vld [vmem:[#allocation5 + $0x68] sm:$0xff] }
  0x42   :  { %6594 = vst [vmem:[#allocation11_spill] sm:$0xff] %v5084_v48  ;;  %v4253_v29 = vpack.c.bf16 %v336_v47, %v329_v37  ;;  %4232 = vmatprep.subr.bf16.mxu0 %v5084_v48  ;;  %v5095_v55 = vsub.f32 %v84_v59, %v251_v13  ;;  %v6433_v7 = vand.u32 4294901760, %v5041_v17  ;;  %v6435_v57 = vand.u32 4294901760, %v5052_v42 }
  0x43   :  { %v455_v8 = vand.u32 4294901760, %v454_v52  ;;  %v462_v19 = vand.u32 4294901760, %v461_v56  ;;  %v5099_v23 = vpack.c.bf16 %v203_v2, %v200_v24  ;;  %v5101_v61 = vsub.f32 %v67_v1, %v200_v24 }
  0x44   :  { %4254 = vmatpush3.bf16.msra.mxu1 %v4253_v29  ;;  %v342_v37 = vsub.f32 %v5041_v17, %v6433_v7  ;;  %v349_v59 = vsub.f32 %v5052_v42, %v6435_v57  ;;  %v254_v13 = vand.u32 4294901760, %v85_v3  ;;  %v257_v47 = vand.u32 4294901760, %v86_v0 }
  0x45   :  { %6595 = vst [vmem:[#allocation12_spill] sm:$0xff] %v5099_v23  ;;  %v4255_v34 = vpack.c.bf16 %v462_v19, %v455_v8  ;;  %4234 = vmatpush3.bf16.msra.mxu0 %v5099_v23  ;;  %v6438_v52 = vand.u32 4294901760, %v5056_v50  ;;  %v6440_v1 = vand.u32 4294901760, %v5065_v60  ;;  %v206_v24 = vand.u32 4294901760, %v69_v6  ;;  %v51_v23 = vld [vmem:[#allocation2 + $0x40] sm:$0xff] }
  0x46   :  { %v5112_v56 = vsub.f32 %v68_v18, %v203_v2  ;;  %v343_v29 = vand.u32 4294901760, %v342_v37  ;;  %v350_v33 = vand.u32 4294901760, %v349_v59  ;;  %v5114_v7 = vpack.c.bf16 %v257_v47, %v254_v13  ;;  %v71_v37 = vld [vmem:[#allocation5 + $0x70] sm:$0xff] }
  0x47   :  { %4256 = vmatprep.subr.bf16.mxu1 %v4255_v34  ;;  %v5116_v10 = vsub.f32 %v85_v3, %v254_v13  ;;  %v468_v8 = vsub.f32 %v5056_v50, %v6438_v52  ;;  %v475_v19 = vsub.f32 %v5065_v60, %v6440_v1  ;;  %v209_v57 = vand.u32 4294901760, %v70_v11  ;;  %v72_v1 = vld [vmem:[#allocation5 + $0x78] sm:$0xff] }
  0x48   :  { %6596 = vst [vmem:[#allocation13_spill] sm:$0xff] %v5114_v7  ;;  %v4257_v18 = vpack.c.bf16 %v350_v33, %v343_v29  ;;  %4236 = vmatprep.subr.bf16.mxu0 %v5114_v7  ;;  %v5125_v2 = vsub.f32 %v86_v0, %v257_v47  ;;  %v6443_v34 = vand.u32 4294901760, %v5071_v5  ;;  %v6445_v3 = vand.u32 4294901760, %v5082_v30 }
  0x49   :  { %v469_v59 = vand.u32 4294901760, %v468_v8  ;;  %v476_v13 = vand.u32 4294901760, %v475_v19  ;;  %v5129_v52 = vpack.c.bf16 %v209_v57, %v206_v24  ;;  %v5131_v53 = vsub.f32 %v69_v6, %v206_v24 }
  0x4a   :  { %4258 = vmatpush3.bf16.msra.mxu1 %v4257_v18  ;;  %v356_v33 = vsub.f32 %v5071_v5, %v6443_v34  ;;  %v363_v0 = vsub.f32 %v5082_v30, %v6445_v3  ;;  %v260_v47 = vand.u32 4294901760, %v87_v9  ;;  %v263_v29 = vand.u32 4294901760, %v88_v54 }
  0x4b   :  { %6597 = vst [vmem:[#allocation14_spill] sm:$0xff] %v5129_v52  ;;  %v4259_v36 = vpack.c.bf16 %v476_v13, %v469_v59  ;;  %4238 = vmatpush3.bf16.msra.mxu0 %v5129_v52  ;;  %v6449_v8 = vand.u32 4294901760, %v5086_v51  ;;  %v6450_v6 = vand.u32 4294901760, %v5095_v55  ;;  %v212_v24 = vand.u32 4294901760, %v71_v37 }
  0x4c   :  { %v5142_v19 = vsub.f32 %v70_v11, %v209_v57  ;;  %v357_v18 = vand.u32 4294901760, %v356_v33  ;;  %v364_v35 = vand.u32 4294901760, %v363_v0  ;;  %v5144_v34 = vpack.c.bf16 %v263_v29, %v260_v47 }
  0x4d   :  { %4260 = vmatprep.subr.bf16.mxu1 %v4259_v36  ;;  %v5146_v44 = vsub.f32 %v87_v9, %v260_v47  ;;  %v482_v59 = vsub.f32 %v5086_v51, %v6449_v8  ;;  %v489_v13 = vsub.f32 %v5095_v55, %v6450_v6  ;;  %v215_v3 = vand.u32 4294901760, %v72_v1  ;;  %v43_v9 = vld [vmem:[#allocation2] sm:$0xff] }
  0x4e   :  { %6598 = vst [vmem:[#allocation15_spill] sm:$0xff] %v5144_v34  ;;  %v4261_v52 = vpack.c.bf16 %v364_v35, %v357_v18  ;;  %4240 = vmatprep.subr.bf16.mxu0 %v5144_v34  ;;  %v5155_v11 = vsub.f32 %v88_v54, %v263_v29  ;;  %v6451_v57 = vand.u32 4294901760, %v5101_v61  ;;  %v6452_v36 = vand.u32 4294901760, %v5112_v56 }
  0x4f   :  { %v483_v33 = vand.u32 4294901760, %v482_v59  ;;  %v490_v0 = vand.u32 4294901760, %v489_v13  ;;  %v5159_v47 = vpack.c.bf16 %v215_v3, %v212_v24  ;;  %v5161_v8 = vsub.f32 %v71_v37, %v212_v24 }
  0x50   :  { %4262 = vmatpush3.bf16.msra.mxu1 %v4261_v52  ;;  %v370_v35 = vsub.f32 %v5101_v61, %v6451_v57  ;;  %v377_v54 = vsub.f32 %v5112_v56, %v6452_v36  ;;  %v5169_v29 = vand.u32 4294901760, %v44_v41  ;;  %v6455_v18 = vand.u32 4294901760, %v5116_v10 }
  0x51   :  { %6599 = vst [vmem:[#allocation16_spill] sm:$0xff] %v5159_v47  ;;  %v4263_v6 = vpack.c.bf16 %v490_v0, %v483_v33  ;;  %4242 = vmatpush3.bf16.msra.mxu0 %v5159_v47  ;;  %v6461_v59 = vand.u32 4294901760, %v5125_v2  ;;  %v4275_v52 = vpack.c.bf16 %v4986_v32, %v4984_v31  ;;  %v5176_v37 = vand.u32 4294901760, %v43_v9 }
  0x52   :  { %6600 = vst [vmem:[#allocation17_spill] sm:$0xff] %v5169_v29  ;;  %v371_v24 = vand.u32 4294901760, %v370_v35  ;;  %v378_v13 = vand.u32 4294901760, %v377_v54  ;;  %v5179_v57 = vsub.f32 %v44_v41, %v5169_v29  ;;  %v496_v36 = vsub.f32 %v5116_v10, %v6455_v18  ;;  %521 = vmatprep.mubr.f32.mxu1 %v5169_v29 }
  0x53   :  { %4264 = vmatprep.subr.bf16.mxu1 %v4263_v6  ;;  %v503_v33 = vsub.f32 %v5125_v2, %v6461_v59  ;;  %4276 = vmatprep.subr.bf16.mxu0 %v4275_v52  ;;  %v5189_v0 = vsub.f32 %v43_v9, %v5176_v37  ;;  %v6460_v35 = vand.u32 4294901760, %v5131_v53  ;;  %v6462_v41 = vand.u32 4294901760, %v5142_v19 }
  0x54   :  { %v5193_v54 = vsub.f32 %v72_v1, %v215_v3  ;;  %v4265_v47 = vpack.c.bf16 %v378_v13, %v371_v24  ;;  %v6463_v18 = vand.u32 4294901760, %v5179_v57  ;;  %v497_v34 = vand.u32 4294901760, %v496_v36 }
  0x55   :  { %6601 = vst [vmem:[#allocation18_spill] sm:$0xff] %v5189_v0  ;;  %v504_v29 = vand.u32 4294901760, %v503_v33  ;;  %v6468_v6 = vand.u32 4294901760, %v5189_v0  ;;  %v384_v52 = vsub.f32 %v5131_v53, %v6460_v35  ;;  %v391_v9 = vsub.f32 %v5142_v19, %v6462_v41 }
  0x56   :  { %4266 = vmatpush3.bf16.msra.mxu1 %v4265_v47  ;;  %v268_v1 = vsub.f32 %v5179_v57, %v6463_v18  ;;  %v4277_v3 = vpack.c.bf16 %v4970_v21, %v4966_v15  ;;  %v6469_v36 = vand.u32 4294901760, %v5146_v44  ;;  %v6470_v24 = vand.u32 4294901760, %v5155_v11 }
  0x57   :  { %v4267_v13 = vpack.c.bf16 %v504_v29, %v497_v34  ;;  %v274_v33 = vsub.f32 %v5189_v0, %v6468_v6  ;;  %v385_v35 = vand.u32 4294901760, %v384_v52  ;;  %v392_v59 = vand.u32 4294901760, %v391_v9 }
  0x58   :  { %v269_v41 = vand.u32 4294901760, %v268_v1  ;;  %v510_v47 = vsub.f32 %v5146_v44, %v6469_v36  ;;  %v517_v18 = vsub.f32 %v5155_v11, %v6470_v24  ;;  %v6472_v7 = vand.u32 4294901760, %v5161_v8 }
  0x59   :  { %4268 = vmatprep.subr.bf16.mxu1 %v4267_v13  ;;  %v275_v34 = vand.u32 4294901760, %v274_v33  ;;  %v4269_v29 = vpack.c.bf16 %v392_v59, %v385_v35  ;;  %v4279_v6 = vpack.c.bf16 %v4977_v26, %v4975_v25  ;;  %v6471_v52 = vand.u32 4294901760, %v5193_v54  ;;  %v50_v59 = vld [vmem:[#allocation2 + $0x38] sm:$0xff] }
  0x5a   :  { %270 = vmatprep.mubr.f32.mxu0 %v269_v41  ;;  %v511_v9 = vand.u32 4294901760, %v510_v47  ;;  %v518_v1 = vand.u32 4294901760, %v517_v18  ;;  %v398_v36 = vsub.f32 %v5161_v8, %v6472_v7  ;;  %v5229_v33 = vand.u32 4294901760, %v51_v23 }
  0x5b   :  { %276 = vmatmul.mubr.f32.vlgmr.msra.gmra.mrb[0].mxu0 %v275_v34  ;;  %4270 = vmatpush3.bf16.msra.mxu1 %v4269_v29  ;;  %v405_v13 = vsub.f32 %v5193_v54, %v6471_v52  ;;  %v4281_v41 = vpack.c.bf16 %v4991_v38, %v4981_v28  ;;  %v4283_v47 = vpack.c.bf16 %v4998_v43, %v4995_v40  ;;  %v5238_v29 = vand.u32 4294901760, %v50_v59 }
  0x5c   :  { %4278 = vmatpush3.bf16.msra.mxu0 %v4277_v3  ;;  %v4271_v35 = vpack.c.bf16 %v518_v1, %v511_v9  ;;  %v399_v24 = vand.u32 4294901760, %v398_v36  ;;  %v5236_v34 = vsub.f32 %v51_v23, %v5229_v33  ;;  %v4285_v3 = vpack.c.bf16 %v5021_v58, %v5003_v46 }
  0x5d   :  { %4280 = vmatprep.subr.bf16.mxu0 %v4279_v6  ;;  %v406_v18 = vand.u32 4294901760, %v405_v13  ;;  %v4287_v36 = vpack.c.bf16 %v5037_v12, %v5025_v63  ;;  %v6602_v9 = vand.u32 4294901760, %v4984_v31  ;;  %v6603_v6 = vand.u32 4294901760, %v4986_v32 }
  0x5e   :  { %4272 = vmatprep.subr.bf16.mxu1 %v4271_v35  ;;  %v282_v13 = vand.u32 4294901760, %v5236_v34  ;;  %v5250_v23 = vsub.f32 %v50_v59, %v5238_v29  ;;  %v6604_v35 = vand.u32 4294901760, %v4966_v15  ;;  %v6606_v7 = vand.u32 4294901760, %v4975_v25 }
  0x5f   :  { %v4273_v52 = vpack.c.bf16 %v406_v18, %v399_v24  ;;  %v4339_v1 = vpack.c.bf16 %v6603_v6, %v6602_v9  ;;  %v6605_v24 = vand.u32 4294901760, %v4970_v21  ;;  %v6607_v0 = vand.u32 4294901760, %v4977_v26 }
  0x60   :  { %4282 = vmatpush3.bf16.msra.mxu0 %v4281_v41  ;;  %v6608_v31 = vand.u32 4294901760, %v4981_v28  ;;  %v6609_v32 = vand.u32 4294901760, %v4991_v38  ;;  %v6610_v59 = vand.u32 4294901760, %v4995_v40  ;;  %v6611_v15 = vand.u32 4294901760, %v4998_v43 }
  0x61   :  { %v4341_v18 = vpack.c.bf16 %v6605_v24, %v6604_v35  ;;  %v5260_v48 = vpack.c.bf16 %v6607_v0, %v6606_v7  ;;  %4274 = vmatpush3.bf16.msra.mxu1 %v4273_v52  ;;  %4284 = vmatprep.subr.bf16.mxu0 %v4283_v47  ;;  %v6612_v25 = vand.u32 4294901760, %v5003_v46  ;;  %v6613_v26 = vand.u32 4294901760, %v5021_v58 }
  0x62   :  { %v5266_v41 = vpack.c.bf16 %v6609_v32, %v6608_v31  ;;  %v5272_v21 = vpack.c.bf16 %v6611_v15, %v6610_v59  ;;  %4308 = vmatprep.subr.bf16.mxu1 %v4964_v14  ;;  %v283_v28 = vsub.f32 %v5236_v34, %v282_v13  ;;  %v288_v38 = vand.u32 4294901760, %v5250_v23 }
  0x63   :  { %v5278_v7 = vpack.c.bf16 %v6613_v26, %v6612_v25  ;;  %v6614_v40 = vand.u32 4294901760, %v5025_v63  ;;  %v6615_v43 = vand.u32 4294901760, %v5037_v12  ;;  %v6616_v46 = vand.u32 4294901760, %v5041_v17  ;;  %v6624_v25 = vld [vmem:[#allocation12_spill] sm:$0xff]  ;;  %v105_v26 = vld [vmem:[#allocation5 + $0x180] sm:$0xff] }
  0x64   :  { %v6617_v58 = vand.u32 4294901760, %v5052_v42  ;;  %v6618_v47 = vand.u32 4294901760, %v5056_v50  ;;  %v6619_v9 = vand.u32 4294901760, %v5065_v60  ;;  %v6620_v35 = vand.u32 4294901760, %v5071_v5  ;;  %523 = vmatmul.mubr.f32.vlgmr.msra.gmra.mrb[0].mxu1 %v5176_v37  ;;  %4286 = vmatpush3.bf16.msra.mxu0 %v4285_v3 }
  0x65   :  { %v5289_v0 = vpack.c.bf16 %v6615_v43, %v6614_v40  ;;  %v6621_v63 = vand.u32 4294901760, %v5082_v30  ;;  %v4289_v12 = vpack.c.bf16 %v5052_v42, %v5041_v17  ;;  %v284_v31 = vand.u32 4294901760, %v283_v28  ;;  %4310 = vmatpush3.bf16.msra.mxu1 %v4968_v20  ;;  %4288 = vmatprep.subr.bf16.mxu0 %v4287_v36  ;;  %v6623_v36 = vld [vmem:[#allocation11_spill] sm:$0xff]  ;;  %v106_v28 = vld [vmem:[#allocation5 + $0x188] sm:$0xff]  ;;  %v6625_v40 = vld [vmem:[#allocation13_spill] sm:$0xff] }
  0x66   :  { %v5295_v52 = vpack.c.bf16 %v6617_v58, %v6616_v46  ;;  %v5301_v6 = vpack.c.bf16 %v6619_v9, %v6618_v47  ;;  %v289_v32 = vsub.f32 %v5250_v23, %v288_v38  ;;  %v4291_v59 = vpack.c.bf16 %v5065_v60, %v5056_v50  ;;  %4312 = vmatprep.subr.bf16.mxu1 %v4972_v22  ;;  %v6626_v43 = vld [vmem:[#allocation18_spill] sm:$0xff]  ;;  %v89_v46 = vld [vmem:[#allocation5 + $0x100] sm:$0xff]  ;;  %v90_v58 = vld [vmem:[#allocation5 + $0x108] sm:$0xff] }
  0x67   :  { %v5307_v24 = vpack.c.bf16 %v6621_v63, %v6620_v35  ;;  %285 = vmatprep.mubr.f32.mxu0 %v284_v31  ;;  %528 = vmatprep.mubr.f32.mxu1 %v5229_v33  ;;  %v4293_v17 = vpack.c.bf16 %v5082_v30, %v5071_v5  ;;  %v4295_v42 = vpack.c.bf16 %v5095_v55, %v5086_v51  ;;  %v6622_v50 = vand.u32 4294901760, %v5179_v57  ;;  %v6627_v35 = vld [vmem:[#allocation14_spill] sm:$0xff]  ;;  %v6628_v63 = vld [vmem:[#allocation15_spill] sm:$0xff]  ;;  %v6629_v31 = vld [vmem:[#allocation17_spill] sm:$0xff] }
  0x68   :  { %v290_v15 = vand.u32 4294901760, %v289_v32  ;;  %4290 = vmatpush3.bf16.msra.mxu0 %v4289_v12  ;;  %530 = vmatmul.mubr.f32.gmra.mrb[2].mxu1 %v5238_v29  ;;  %v4297_v60 = vpack.c.bf16 %v5112_v56, %v5101_v61  ;;  %v4299_v5 = vpack.c.bf16 %v5125_v2, %v5116_v10  ;;  %v4301_v30 = vpack.c.bf16 %v5142_v19, %v5131_v53 }
  0x69   :  { %4314 = vmatpush3.bf16.msra.mxu1 %v4979_v27  ;;  %4292 = vmatprep.subr.bf16.mxu0 %v4291_v59  ;;  %v4305_v3 = vpack.c.bf16 %v5193_v54, %v5161_v8  ;;  %v1136_v47 = vand.u32 4294901760, %v105_v26  ;;  %v1139_v9 = vand.u32 4294901760, %v106_v28  ;;  %v1091_v12 = vand.u32 4294901760, %v90_v58  ;;  %v107_v59 = vld [vmem:[#allocation5 + $0x190] sm:$0xff] }
  0x6a   :  { %4316 = vmatprep.subr.bf16.mxu1 %v4993_v39  ;;  %291 = vmatmul.mubr.f32.gmra.mrb[2].mxu0 %v290_v15  ;;  %v108_v15 = vld [vmem:[#allocation5 + $0x198] sm:$0xff] }
  0x6b   :  { %665 = vmatprep.mubr.f32.mxu0 %v5179_v57  ;;  %781 = vmatprep.mubr.f32.mxu1 %v6622_v50  ;;  %v4303_v57 = vpack.c.bf16 %v5155_v11, %v5146_v44  ;;  %v5356_v32 = vsub.f32 %v105_v26, %v1136_v47  ;;  %v91_v50 = vld [vmem:[#allocation5 + $0x110] sm:$0xff]  ;;  %v6633_v26 = vand.u32 4294901760, %v6626_v43 }
  0x6c   :  { %4294 = vmatpush3.bf16.msra.mxu0 %v4293_v17  ;;  %v6630_v17 = vld [vmem:[#allocation16_spill] sm:$0xff] }
  0x6d   :  { %4318 = vmatpush3.bf16.msra.mxu1 %v5001_v45  ;;  %4296 = vmatprep.subr.bf16.mxu0 %v4295_v42  ;;  %v5365_v42 = vsub.f32 %v90_v58, %v1091_v12 }
  0x6e   :  { %4320 = vmatprep.subr.bf16.mxu1 %v5023_v62 }
  0x70   :  { %4298 = vmatpush3.bf16.msra.mxu0 %v4297_v60  ;;  %v6631_v60 = vand.u32 4294901760, %v5086_v51  ;;  %v6637_v51 = vand.u32 4294901760, %v5125_v2  ;;  %v6641_v2 = vand.u32 4294901760, %v5155_v11  ;;  %v6477_v11 = vand.u32 4294901760, %v5365_v42 }
  0x71   :  { %4322 = vmatpush3.bf16.msra.mxu1 %v5039_v16  ;;  %4300 = vmatprep.subr.bf16.mxu0 %v4299_v5  ;;  %v6632_v5 = vand.u32 4294901760, %v5095_v55  ;;  %v109_v55 = vld [vmem:[#allocation5 + $0x1a0] sm:$0xff] }
  0x72   :  { %4324 = vmatprep.subr.bf16.mxu1 %v5054_v49 }
  0x74   :  { %4302 = vmatpush3.bf16.msra.mxu0 %v4301_v30  ;;  %v4359_v30 = vpack.c.bf16 %v6632_v5, %v6631_v60  ;;  %v6487_v60 = vand.u32 4294901760, %v5356_v32 }
  0x75   :  { %4326 = vmatpush3.bf16.msra.mxu1 %v5069_v4  ;;  %4304 = vmatprep.subr.bf16.mxu0 %v4303_v57  ;;  %v1142_v57 = vand.u32 4294901760, %v107_v59 }
  0x76   :  { %4328 = vmatprep.subr.bf16.mxu1 %v6623_v36 }
  0x78   :  { %4306 = vmatpush3.bf16.msra.mxu0 %v4305_v3  ;;  %v1145_v3 = vand.u32 4294901760, %v108_v15 }
  0x79   :  { %4330 = vmatpush3.bf16.msra.mxu1 %v6624_v25  ;;  %4340 = vmatprep.subr.bf16.mxu0 %v4339_v1  ;;  %v1088_v1 = vand.u32 4294901760, %v89_v46 }
  0x7a   :  { %4332 = vmatprep.subr.bf16.mxu1 %v6625_v40 }
  0x7b   :  { %668 = vmatmul.mubr.f32.vlgmr.msra.gmra.mrb[4].mxu0 %v6626_v43 }
  0x7c   :  { %4342 = vmatpush3.bf16.msra.mxu0 %v4341_v18  ;;  %674 = vmatprep.mubr.f32.mxu0 %v5236_v34  ;;  %v5358_v18 = vsub.f32 %v106_v28, %v1139_v9  ;;  %v5411_v34 = vpack.c.bf16 %v1139_v9, %v1136_v47  ;;  %v1330_v47 = vsub.f32 %v5356_v32, %v6487_v60 }
  0x7d   :  { %4334 = vmatpush3.bf16.msra.mxu1 %v6627_v35  ;;  %4344 = vmatprep.subr.bf16.mxu0 %v5260_v48  ;;  %v5363_v48 = vsub.f32 %v89_v46, %v1088_v1  ;;  %v6636_v46 = vand.u32 4294901760, %v5116_v10  ;;  %v6640_v10 = vand.u32 4294901760, %v5146_v44 }
  0x7e   :  { %4336 = vmatprep.subr.bf16.mxu1 %v6628_v63  ;;  %v6483_v43 = vand.u32 4294901760, %v5358_v18  ;;  %6644 = vst [vmem:[#allocation11_spill] sm:$0xff] %v5411_v34 }
  0x7f   :  { %677 = vmatmul.mubr.f32.gmra.mrb[6].mxu0 %v5250_v23  ;;  %v5384_v58 = vpack.c.bf16 %v6637_v51, %v6636_v46  ;;  %v5401_v5 = vpack.c.bf16 %v6641_v2, %v6640_v10  ;;  %v6478_v44 = vand.u32 4294901760, %v5363_v48  ;;  %v5417_v46 = vsub.f32 %v107_v59, %v1142_v57 }
  0x80   :  { %4346 = vmatpush3.bf16.msra.mxu0 %v5266_v41  ;;  %962 = vmatprep.mubr.f32.mxu0 %v6629_v31  ;;  %v92_v41 = vld [vmem:[#allocation5 + $0x118] sm:$0xff]  ;;  %v5419_v51 = vsub.f32 %v108_v15, %v1145_v3  ;;  %v1337_v9 = vsub.f32 %v5358_v18, %v6483_v43 }
  0x81   :  { %4338 = vmatpush3.bf16.msra.mxu1 %v6630_v17  ;;  %4348 = vmatprep.subr.bf16.mxu0 %v5272_v21  ;;  %v6635_v21 = vand.u32 4294901760, %v5112_v56  ;;  %v6639_v56 = vand.u32 4294901760, %v5142_v19 }
  0x82   :  { %4372 = vmatprep.subr.bf16.mxu1 %v4964_v14  ;;  %v6634_v14 = vand.u32 4294901760, %v5101_v61  ;;  %v6638_v61 = vand.u32 4294901760, %v5131_v53  ;;  %v6643_v53 = vand.u32 4294901760, %v5193_v54  ;;  %v1338_v10 = vand.u32 4294901760, %v1337_v9 }
  0x84   :  { %785 = vmatmul.mubr.f32.vlgmr.msra.gmra.mrb[4].mxu1 %v6633_v26  ;;  %4350 = vmatpush3.bf16.msra.mxu0 %v5278_v7  ;;  %v5378_v28 = vpack.c.bf16 %v6635_v21, %v6634_v14  ;;  %v5395_v7 = vpack.c.bf16 %v6639_v56, %v6638_v61  ;;  %v1094_v26 = vand.u32 4294901760, %v91_v50  ;;  %v1097_v14 = vand.u32 4294901760, %v92_v41  ;;  %v110_v21 = vld [vmem:[#allocation5 + $0x1a8] sm:$0xff] }
  0x85   :  { %4374 = vmatpush3.bf16.msra.mxu1 %v4968_v20  ;;  %792 = vmatprep.mubr.f32.mxu1 %v282_v13  ;;  %v6642_v20 = vand.u32 4294901760, %v5161_v8  ;;  %v5415_v13 = vpack.c.bf16 %v1091_v12, %v1088_v1  ;;  %v94_v61 = vld [vmem:[#allocation5 + $0x128] sm:$0xff]  ;;  %v5424_v8 = vpack.c.bf16 %v1145_v3, %v1142_v57  ;;  %v1151_v54 = vand.u32 4294901760, %v110_v21  ;;  %v111_v1 = vld [vmem:[#allocation5 + $0x1b0] sm:$0xff] }
  0x86   :  { %4352 = vmatprep.subr.bf16.mxu0 %v5289_v0  ;;  %4376 = vmatprep.subr.bf16.mxu1 %v4972_v22  ;;  %v1148_v0 = vand.u32 4294901760, %v109_v55  ;;  %v93_v22 = vld [vmem:[#allocation5 + $0x120] sm:$0xff]  ;;  %v5434_v23 = vpack.c.bf16 %v1097_v14, %v1094_v26  ;;  %v46_v12 = vld [vmem:[#allocation2 + $0x18] sm:$0xff]  ;;  %v1103_v15 = vand.u32 4294901760, %v94_v61  ;;  %v1218_v57 = vsub.f32 %v5363_v48, %v6478_v44 }
  0x87   :  { %v5409_v19 = vpack.c.bf16 %v6643_v53, %v6642_v20  ;;  %6645 = vst [vmem:[#allocation12_spill] sm:$0xff] %v5415_v13  ;;  %6646 = vst [vmem:[#allocation13_spill] sm:$0xff] %v5424_v8  ;;  %v1100_v59 = vand.u32 4294901760, %v93_v22  ;;  %v6482_v3 = vand.u32 4294901760, %v5417_v46  ;;  %v1331_v56 = vand.u32 4294901760, %v1330_v47  ;;  %v96_v20 = vld [vmem:[#allocation5 + $0x138] sm:$0xff] }
  0x88   :  { %796 = vmatmul.mubr.f32.gmra.mrb[6].mxu1 %v288_v38  ;;  %4354 = vmatpush3.bf16.msra.mxu0 %v5295_v52  ;;  %v5436_v38 = vsub.f32 %v91_v50, %v1094_v26  ;;  %v5438_v52 = vsub.f32 %v92_v41, %v1097_v14  ;;  %v5448_v50 = vsub.f32 %v109_v55, %v1148_v0  ;;  %v1154_v41 = vand.u32 4294901760, %v111_v1  ;;  %v95_v14 = vld [vmem:[#allocation5 + $0x130] sm:$0xff] }
  0x89   :  { %4378 = vmatpush3.bf16.msra.mxu1 %v4979_v27  ;;  %4356 = vmatprep.subr.bf16.mxu0 %v5301_v6  ;;  %v1225_v27 = vsub.f32 %v5365_v42, %v6477_v11  ;;  %v112_v6 = vld [vmem:[#allocation5 + $0x1b8] sm:$0xff]  ;;  %v5455_v2 = vand.u32 4294901760, %v46_v12  ;;  %v5458_v26 = vsub.f32 %v110_v21, %v1151_v54  ;;  %v1219_v47 = vand.u32 4294901760, %v1218_v57  ;;  %v114_v57 = vld [vmem:[#allocation5 + $0x1c8] sm:$0xff] }
  0x8a   :  { %4380 = vmatprep.subr.bf16.mxu1 %v4993_v39  ;;  %1073 = vmatprep.mubr.f32.mxu1 %v6629_v31  ;;  %v6479_v39 = vand.u32 4294901760, %v5419_v51  ;;  %v5453_v31 = vpack.c.bf16 %v1151_v54, %v1148_v0  ;;  %v1157_v55 = vand.u32 4294901760, %v112_v6  ;;  %v6480_v53 = vand.u32 4294901760, %v5436_v38 }
  0x8b   :  { %6647 = vst [vmem:[#allocation18_spill] sm:$0xff] %v5455_v2  ;;  %v6481_v11 = vand.u32 4294901760, %v5438_v52  ;;  %v5465_v0 = vsub.f32 %v93_v22, %v1100_v59  ;;  %v1226_v9 = vand.u32 4294901760, %v1225_v27  ;;  %v5467_v44 = vsub.f32 %v94_v61, %v1103_v15 }
  0x8c   :  { %4358 = vmatpush3.bf16.msra.mxu0 %v5307_v24  ;;  %v5463_v24 = vpack.c.bf16 %v1103_v15, %v1100_v59  ;;  %v1351_v21 = vsub.f32 %v5419_v51, %v6479_v39  ;;  %v1106_v22 = vand.u32 4294901760, %v95_v14  ;;  %v1109_v54 = vand.u32 4294901760, %v96_v20  ;;  %v113_v59 = vld [vmem:[#allocation5 + $0x1c0] sm:$0xff] }
  0x8d   :  { %4382 = vmatpush3.bf16.msra.mxu1 %v5001_v45  ;;  %4360 = vmatprep.subr.bf16.mxu0 %v4359_v30  ;;  %v5469_v45 = vsub.f32 %v111_v1, %v1154_v41  ;;  %v1344_v30 = vsub.f32 %v5417_v46, %v6482_v3  ;;  %v5481_v61 = vsub.f32 %v46_v12, %v5455_v2  ;;  %v5500_v39 = vld [vmem:[#allocation5 + $0x140] sm:$0xff] }
  0x8e   :  { %4384 = vmatprep.subr.bf16.mxu1 %v5023_v62  ;;  %6648 = vst [vmem:[#allocation14_spill] sm:$0xff] %v5463_v24  ;;  %v5478_v62 = vpack.c.bf16 %v1338_v10, %v1331_v56  ;;  %v5485_v1 = vpack.c.bf16 %v1157_v55, %v1154_v41  ;;  %v1232_v15 = vsub.f32 %v5436_v38, %v6480_v53  ;;  %v1352_v56 = vand.u32 4294901760, %v1351_v21  ;;  %v5502_v53 = vld [vmem:[#allocation5 + $0x148] sm:$0xff] }
  0x8f   :  { %6649 = vst [vmem:[#allocation15_spill] sm:$0xff] %v5469_v45  ;;  %v5494_v27 = vpack.c.bf16 %v1226_v9, %v1219_v47  ;;  %v5496_v12 = vsub.f32 %v112_v6, %v1157_v55  ;;  %v1345_v41 = vand.u32 4294901760, %v1344_v30  ;;  %v1160_v10 = vand.u32 4294901760, %v113_v59 }
  0x90   :  { %4362 = vmatpush3.bf16.msra.mxu0 %v5378_v28  ;;  %6650 = vst [vmem:[#allocation17_spill] sm:$0xff] %v5485_v1  ;;  %v1239_v28 = vsub.f32 %v5438_v52, %v6481_v11  ;;  %v6484_v11 = vand.u32 4294901760, %v5465_v0  ;;  %v1163_v47 = vand.u32 4294901760, %v114_v57  ;;  %v6488_v6 = vand.u32 4294901760, %v5467_v44 }
  0x91   :  { %4386 = vmatpush3.bf16.msra.mxu1 %v5039_v16  ;;  %4364 = vmatprep.subr.bf16.mxu0 %v5384_v58  ;;  %6651 = vst [vmem:[#allocation16_spill] sm:$0xff] %v5496_v12  ;;  %v6486_v16 = vand.u32 4294901760, %v5448_v50  ;;  %v6485_v58 = vand.u32 4294901760, %v5458_v26  ;;  %v6489_v55 = vand.u32 4294901760, %v5481_v61  ;;  %v5512_v9 = vsub.f32 %v95_v14, %v1106_v22 }
  0x92   :  { %4388 = vmatprep.subr.bf16.mxu1 %v5054_v49  ;;  %v5506_v49 = vpack.c.bf16 %v1109_v54, %v1106_v22  ;;  %v5514_v30 = vsub.f32 %v96_v20, %v1109_v54  ;;  %v1233_v21 = vand.u32 4294901760, %v1232_v15  ;;  %v1240_v3 = vand.u32 4294901760, %v1239_v28  ;;  %v115_v22 = vld [vmem:[#allocation5 + $0x1d0] sm:$0xff] }
  0x93   :  { %6653 = vst [vmem:[#allocation20_spill] sm:$0xff] %v5512_v9  ;;  %v1365_v43 = vsub.f32 %v5458_v26, %v6485_v58  ;;  %v5525_v14 = vpack.c.bf16 %v1352_v56, %v1345_v41  ;;  %v1246_v20 = vsub.f32 %v5465_v0, %v6484_v11  ;;  %v5533_v15 = vpack.c.bf16 %v1163_v47, %v1160_v10  ;;  %v116_v56 = vld [vmem:[#allocation5 + $0x1d8] sm:$0xff] }
  0x94   :  { %4366 = vmatpush3.bf16.msra.mxu0 %v5395_v7  ;;  %6652 = vst [vmem:[#allocation19_spill] sm:$0xff] %v5506_v49  ;;  %6654 = vst [vmem:[#allocation21_spill] sm:$0xff] %v5514_v30  ;;  %v1358_v7 = vsub.f32 %v5448_v50, %v6486_v16  ;;  %v5535_v28 = vsub.f32 %v113_v59, %v1160_v10  ;;  %v1253_v41 = vsub.f32 %v5467_v44, %v6488_v6  ;;  %v99_v16 = vld [vmem:[#allocation5 + $0x150] sm:$0xff]  ;;  %v100_v59 = vld [vmem:[#allocation5 + $0x158] sm:$0xff] }
  0x95   :  { %4390 = vmatpush3.bf16.msra.mxu1 %v5069_v4  ;;  %4368 = vmatprep.subr.bf16.mxu0 %v5401_v5  ;;  %v1112_v4 = vand.u32 4294901760, %v5500_v39  ;;  %v1115_v5 = vand.u32 4294901760, %v5502_v53  ;;  %6655 = vst [vmem:[#allocation22_spill] sm:$0xff] %v5533_v15  ;;  %v1186_v11 = vsub.f32 %v5481_v61, %v6489_v55  ;;  %v5545_v58 = vpack.c.bf16 %v1240_v3, %v1233_v21 }
  0x96   :  { %4392 = vmatprep.subr.bf16.mxu1 %v6623_v36  ;;  %v1359_v6 = vand.u32 4294901760, %v1358_v7  ;;  %v1366_v54 = vand.u32 4294901760, %v1365_v43  ;;  %v1166_v55 = vand.u32 4294901760, %v115_v22  ;;  %v1169_v3 = vand.u32 4294901760, %v116_v56 }
  0x97   :  { %v5552_v36 = vpack.c.bf16 %v1115_v5, %v1112_v4  ;;  %v6658_v21 = vand.u32 4294901760, %v5496_v12  ;;  %v1118_v43 = vand.u32 4294901760, %v99_v16  ;;  %v1121_v7 = vand.u32 4294901760, %v100_v59 }
  0x98   :  { %4370 = vmatpush3.bf16.msra.mxu0 %v5409_v19  ;;  %v5547_v19 = vsub.f32 %v114_v57, %v1163_v47  ;;  %v6657_v57 = vand.u32 4294901760, %v5469_v45  ;;  %v1187_v60 = vand.u32 4294901760, %v1186_v11  ;;  %v5574_v11 = vpack.c.bf16 %v1366_v54, %v1359_v6 }
  0x99   :  { %4394 = vmatpush3.bf16.msra.mxu1 %v6624_v25  ;;  %4404 = vmatprep.subr.bf16.mxu0 %v5411_v34  ;;  %6656 = vst [vmem:[#allocation23_spill] sm:$0xff] %v5552_v36  ;;  %v1247_v25 = vand.u32 4294901760, %v1246_v20  ;;  %v1379_v10 = vsub.f32 %v5496_v12, %v6658_v21  ;;  %v6659_v20 = vand.u32 4294901760, %v5512_v9  ;;  %v117_v12 = vld [vmem:[#allocation5 + $0x1e0] sm:$0xff] }
  0x9a   :  { %4396 = vmatprep.subr.bf16.mxu1 %v6625_v40  ;;  %v1372_v47 = vsub.f32 %v5469_v45, %v6657_v57  ;;  %v1254_v40 = vand.u32 4294901760, %v1253_v41  ;;  %v6660_v45 = vand.u32 4294901760, %v5514_v30 }
  0x9b   :  { %964 = vmatmul.mubr.f32.vlgmr.msra.gmra.mrb[8].mxu0 %v5176_v37  ;;  %v1260_v57 = vsub.f32 %v5512_v9, %v6659_v20  ;;  %v5582_v20 = vsub.f32 %v115_v22, %v1166_v55  ;;  %v1380_v41 = vand.u32 4294901760, %v1379_v10  ;;  %v101_v9 = vld [vmem:[#allocation5 + $0x160] sm:$0xff]  ;;  %v6662_v22 = vand.u32 4294901760, %v5535_v28 }
  0x9c   :  { %4406 = vmatpush3.bf16.msra.mxu0 %v5415_v13  ;;  %969 = vmatprep.mubr.f32.mxu0 %v5229_v33  ;;  %v1267_v21 = vsub.f32 %v5514_v30, %v6660_v45  ;;  %v118_v13 = vld [vmem:[#allocation5 + $0x1e8] sm:$0xff]  ;;  %v5585_v45 = vpack.c.bf16 %v1169_v3, %v1166_v55  ;;  %v5587_v30 = vsub.f32 %v116_v56, %v1169_v3  ;;  %v1373_v34 = vand.u32 4294901760, %v1372_v47  ;;  %v5606_v47 = vld [vmem:[#allocation5 + $0x1f0] sm:$0xff] }
  0x9d   :  { %4398 = vmatpush3.bf16.msra.mxu1 %v6627_v35  ;;  %4408 = vmatprep.subr.bf16.mxu0 %v5424_v8  ;;  %v5577_v35 = vsub.f32 %v5500_v39, %v1112_v4  ;;  %v5580_v8 = vsub.f32 %v5502_v53, %v1115_v5  ;;  %v5590_v6 = vpack.c.bf16 %v1254_v40, %v1247_v25  ;;  %v1172_v53 = vand.u32 4294901760, %v117_v12 }
  0x9e   :  { %4400 = vmatprep.subr.bf16.mxu1 %v6628_v63  ;;  %6661 = vst [vmem:[#allocation24_spill] sm:$0xff] %v5585_v45  ;;  %v102_v63 = vld [vmem:[#allocation5 + $0x168] sm:$0xff]  ;;  %v5592_v39 = vpack.c.bf16 %v1121_v7, %v1118_v43  ;;  %v1175_v4 = vand.u32 4294901760, %v118_v13  ;;  %v1261_v55 = vand.u32 4294901760, %v1260_v57  ;;  %v1268_v5 = vand.u32 4294901760, %v1267_v21  ;;  %v53_v21 = vld [vmem:[#allocation2 + $0x50] sm:$0xff] }
  0x9f   :  { %971 = vmatmul.mubr.f32.gmra.mrb[10].mxu0 %v5238_v29  ;;  %v1386_v54 = vsub.f32 %v5535_v28, %v6662_v22  ;;  %v6663_v56 = vand.u32 4294901760, %v5547_v19  ;;  %v5603_v25 = vsub.f32 %v99_v16, %v1118_v43  ;;  %v1124_v3 = vand.u32 4294901760, %v101_v9  ;;  %v5613_v22 = vld [vmem:[#allocation5 + $0x1f8] sm:$0xff] }
  0xa0   :  { %4410 = vmatpush3.bf16.msra.mxu0 %v5434_v23  ;;  %1188 = vmatprep.mubr.f32.mxu0 %v1187_v60  ;;  %v1127_v60 = vand.u32 4294901760, %v102_v63  ;;  %v5608_v40 = vpack.c.bf16 %v1380_v41, %v1373_v34  ;;  %v5610_v57 = vsub.f32 %v100_v59, %v1121_v7  ;;  %v5620_v16 = vsub.f32 %v117_v12, %v1172_v53  ;;  %v45_v59 = vld [vmem:[#allocation2 + $0x10] sm:$0xff] }
  0xa1   :  { %4402 = vmatpush3.bf16.msra.mxu1 %v6630_v17  ;;  %4412 = vmatprep.subr.bf16.mxu0 %v5453_v31  ;;  %v1393_v10 = vsub.f32 %v5547_v19, %v6663_v56  ;;  %v6504_v17 = vand.u32 4294901760, %v5577_v35  ;;  %v5622_v43 = vsub.f32 %v118_v13, %v1175_v4  ;;  %v6509_v34 = vand.u32 4294901760, %v5587_v30 }
  0xa2   :  { %4436 = vmatprep.subr.bf16.mxu1 %v5478_v62  ;;  %v5618_v62 = vpack.c.bf16 %v1175_v4, %v1172_v53  ;;  %6664 = vst [vmem:[#allocation25_spill] sm:$0xff] %v5620_v16  ;;  %v5627_v7 = vpack.c.bf16 %v1268_v5, %v1261_v55  ;;  %v1387_v41 = vand.u32 4294901760, %v1386_v54  ;;  %v5632_v13 = vpack.c.bf16 %v1127_v60, %v1124_v3  ;;  %v5640_v53 = vld [vmem:[#allocation5 + $0x170] sm:$0xff]  ;;  %v5642_v4 = vld [vmem:[#allocation5 + $0x178] sm:$0xff] }
  0xa3   :  { %v1394_v56 = vand.u32 4294901760, %v1393_v10  ;;  %v5634_v12 = vsub.f32 %v101_v9, %v1124_v3  ;;  %v5644_v55 = vsub.f32 %v102_v63, %v1127_v60  ;;  %v6665_v5 = vand.u32 4294901760, %v5580_v8 }
  0xa4   :  { %1075 = vmatmul.mubr.f32.vlgmr.msra.gmra.mrb[8].mxu1 %v5176_v37  ;;  %4414 = vmatpush3.bf16.msra.mxu0 %v5463_v24  ;;  %v1178_v37 = vand.u32 4294901760, %v5606_v47  ;;  %v6666_v54 = vand.u32 4294901760, %v5582_v20  ;;  %v5652_v10 = vand.u32 4294901760, %v45_v59  ;;  %v1407_v3 = vsub.f32 %v5587_v30, %v6509_v34 }
  0xa5   :  { %4438 = vmatpush3.bf16.msra.mxu1 %v5494_v27  ;;  %1080 = vmatprep.mubr.f32.mxu1 %v5229_v33  ;;  %v1274_v27 = vsub.f32 %v5577_v35, %v6504_v17  ;;  %v1181_v33 = vand.u32 4294901760, %v5613_v22  ;;  %v5661_v17 = vand.u32 4294901760, %v53_v21  ;;  %v6669_v63 = vand.u32 4294901760, %v5610_v57 }
  0xa6   :  { %4416 = vmatprep.subr.bf16.mxu0 %v5485_v1  ;;  %4440 = vmatprep.subr.bf16.mxu1 %v5525_v14  ;;  %v1281_v14 = vsub.f32 %v5580_v8, %v6665_v5  ;;  %v1400_v9 = vsub.f32 %v5582_v20, %v6666_v54  ;;  %v52_v5 = vld [vmem:[#allocation2 + $0x48] sm:$0xff]  ;;  %v4451_v54 = vpack.c.bf16 %v1394_v56, %v1387_v41  ;;  %v1133_v1 = vand.u32 4294901760, %v5642_v4 }
  0xa7   :  { %v1275_v34 = vand.u32 4294901760, %v1274_v27  ;;  %v5672_v60 = vsub.f32 %v5613_v22, %v1181_v33  ;;  %v6668_v27 = vand.u32 4294901760, %v5603_v25 }
  0xa8   :  { %1082 = vmatmul.mubr.f32.gmra.mrb[10].mxu1 %v5238_v29  ;;  %4418 = vmatpush3.bf16.msra.mxu0 %v5506_v49  ;;  %v5666_v29 = vsub.f32 %v5606_v47, %v1178_v37  ;;  %v1130_v49 = vand.u32 4294901760, %v5640_v53  ;;  %v1282_v56 = vand.u32 4294901760, %v1281_v14  ;;  %v1401_v41 = vand.u32 4294901760, %v1400_v9 }
  0xa9   :  { %4442 = vmatpush3.bf16.msra.mxu1 %v5545_v58  ;;  %4420 = vmatprep.subr.bf16.mxu0 %v5533_v15  ;;  %v5678_v47 = vsub.f32 %v45_v59, %v5652_v10  ;;  %v5680_v15 = vand.u32 4294901760, %v52_v5  ;;  %v1288_v22 = vsub.f32 %v5603_v25, %v6668_v27  ;;  %v1295_v58 = vsub.f32 %v5610_v57, %v6669_v63 }
  0xaa   :  { %4444 = vmatprep.subr.bf16.mxu1 %v5574_v11  ;;  %1439 = vmatprep.mubr.f32.mxu1 %v5455_v2  ;;  %v1408_v11 = vand.u32 4294901760, %v1407_v3  ;;  %v5690_v2 = vsub.f32 %v53_v21, %v5661_v17  ;;  %v5695_v59 = vsub.f32 %v5640_v53, %v1130_v49  ;;  %v5698_v14 = vsub.f32 %v5642_v4, %v1133_v1 }
  0xab   :  { %6667 = vst [vmem:[#allocation26_spill] sm:$0xff] %v5680_v15  ;;  %v6670_v63 = vand.u32 4294901760, %v5620_v16  ;;  %v6523_v53 = vand.u32 4294901760, %v5666_v29  ;;  %v4453_v4 = vpack.c.bf16 %v1282_v56, %v1275_v34  ;;  %v6524_v9 = vand.u32 4294901760, %v5678_v47 }
  0xac   :  { %4422 = vmatpush3.bf16.msra.mxu0 %v5552_v36  ;;  %v5711_v36 = vpack.c.bf16 %v1181_v33, %v1178_v37  ;;  %v5715_v3 = vsub.f32 %v52_v5, %v5680_v15  ;;  %v6525_v24 = vand.u32 4294901760, %v5690_v2  ;;  %v6673_v34 = vand.u32 4294901760, %v5634_v12 }
  0xad   :  { %4446 = vmatpush3.bf16.msra.mxu1 %v5590_v6  ;;  %4424 = vmatprep.subr.bf16.mxu0 %v5585_v45  ;;  %v1414_v21 = vsub.f32 %v5620_v16, %v6670_v63  ;;  %v6671_v6 = vand.u32 4294901760, %v5622_v43  ;;  %v6522_v45 = vand.u32 4294901760, %v5672_v60  ;;  %v1289_v63 = vand.u32 4294901760, %v1288_v22 }
  0xae   :  { %4448 = vmatprep.subr.bf16.mxu1 %v5608_v40  ;;  %6672 = vst [vmem:[#allocation27_spill] sm:$0xff] %v5711_v36  ;;  %v4455_v40 = vpack.c.bf16 %v1408_v11, %v1401_v41  ;;  %v1296_v16 = vand.u32 4294901760, %v1295_v58  ;;  %v1302_v37 = vsub.f32 %v5634_v12, %v6673_v34  ;;  %v6674_v33 = vand.u32 4294901760, %v5644_v55 }
  0xaf   :  { %v1421_v27 = vsub.f32 %v5622_v43, %v6671_v6  ;;  %v6526_v56 = vand.u32 4294901760, %v5695_v59  ;;  %v6527_v41 = vand.u32 4294901760, %v5698_v14  ;;  %v1415_v58 = vand.u32 4294901760, %v1414_v21 }
  0xb0   :  { %4426 = vmatpush3.bf16.msra.mxu0 %v5592_v39  ;;  %v1309_v5 = vsub.f32 %v5644_v55, %v6674_v33  ;;  %v1435_v22 = vsub.f32 %v5672_v60, %v6522_v45  ;;  %v1192_v6 = vsub.f32 %v5678_v47, %v6524_v9  ;;  %v5740_v33 = vpack.c.bf16 %v1133_v1, %v1130_v49 }
  0xb1   :  { %4450 = vmatpush3.bf16.msra.mxu1 %v5627_v7  ;;  %4428 = vmatprep.subr.bf16.mxu0 %v5618_v62  ;;  %v1422_v11 = vand.u32 4294901760, %v1421_v27  ;;  %v1428_v7 = vsub.f32 %v5666_v29, %v6523_v53  ;;  %v4467_v21 = vpack.c.bf16 %v5358_v18, %v5356_v32  ;;  %v1201_v27 = vsub.f32 %v5690_v2, %v6525_v24 }
  0xb2   :  { %4452 = vmatprep.subr.bf16.mxu1 %v4451_v54  ;;  %6675 = vst [vmem:[#allocation28_spill] sm:$0xff] %v5740_v33  ;;  %v4457_v54 = vpack.c.bf16 %v1296_v16, %v1289_v63  ;;  %v1303_v45 = vand.u32 4294901760, %v1302_v37  ;;  %v1310_v53 = vand.u32 4294901760, %v1309_v5  ;;  %v1316_v9 = vsub.f32 %v5695_v59, %v6526_v56 }
  0xb3   :  { %v1323_v1 = vsub.f32 %v5698_v14, %v6527_v41  ;;  %v4459_v49 = vpack.c.bf16 %v1422_v11, %v1415_v58  ;;  %v1429_v16 = vand.u32 4294901760, %v1428_v7  ;;  %v1436_v63 = vand.u32 4294901760, %v1435_v22 }
  0xb4   :  { %4430 = vmatpush3.bf16.msra.mxu0 %v5632_v13  ;;  %v1193_v34 = vand.u32 4294901760, %v1192_v6  ;;  %v6676_v24 = vand.u32 4294901760, %v5715_v3  ;;  %v4469_v37 = vpack.c.bf16 %v5365_v42, %v5363_v48  ;;  %v1202_v5 = vand.u32 4294901760, %v1201_v27  ;;  %v6681_v27 = vld [vmem:[#allocation21_spill] sm:$0xff] }
  0xb5   :  { %4454 = vmatpush3.bf16.msra.mxu1 %v4453_v4  ;;  %4432 = vmatprep.subr.bf16.mxu0 %v5711_v36  ;;  %v4461_v56 = vpack.c.bf16 %v1310_v53, %v1303_v45  ;;  %v1317_v58 = vand.u32 4294901760, %v1316_v9  ;;  %v1324_v11 = vand.u32 4294901760, %v1323_v1  ;;  %v4463_v7 = vpack.c.bf16 %v1436_v63, %v1429_v16  ;;  %v6677_v53 = vld [vmem:[#allocation11_spill] sm:$0xff]  ;;  %v6683_v63 = vld [vmem:[#allocation13_spill] sm:$0xff] }
  0xb6   :  { %4456 = vmatprep.subr.bf16.mxu1 %v4455_v40  ;;  %v1207_v4 = vsub.f32 %v5715_v3, %v6676_v24  ;;  %v4471_v40 = vpack.c.bf16 %v5419_v51, %v5417_v46  ;;  %v4473_v24 = vpack.c.bf16 %v5438_v52, %v5436_v38  ;;  %v4475_v45 = vpack.c.bf16 %v5458_v26, %v5448_v50 }
  0xb7   :  { %v4465_v6 = vpack.c.bf16 %v1324_v11, %v1317_v58  ;;  %v4477_v9 = vpack.c.bf16 %v5467_v44, %v5465_v0  ;;  %v4483_v16 = vpack.c.bf16 %v5547_v19, %v5535_v28  ;;  %v6685_v58 = vld [vmem:[#allocation14_spill] sm:$0xff]  ;;  %v6686_v11 = vld [vmem:[#allocation25_spill] sm:$0xff] }
  0xb8   :  { %4434 = vmatpush3.bf16.msra.mxu0 %v5740_v33  ;;  %v1208_v22 = vand.u32 4294901760, %v1207_v4  ;;  %v4485_v4 = vpack.c.bf16 %v5580_v8, %v5577_v35 }
  0xb9   :  { %4458 = vmatpush3.bf16.msra.mxu1 %v4457_v54  ;;  %4468 = vmatprep.subr.bf16.mxu0 %v4467_v21  ;;  %v6679_v54 = vld [vmem:[#allocation16_spill] sm:$0xff] }
  0xba   :  { %4460 = vmatprep.subr.bf16.mxu1 %v4459_v49  ;;  %v6680_v21 = vld [vmem:[#allocation20_spill] sm:$0xff] }
  0xbb   :  { %1194 = vmatmul.mubr.f32.vlgmr.msra.gmra.mrb[12].mxu0 %v1193_v34  ;;  %v6678_v34 = vld [vmem:[#allocation15_spill] sm:$0xff]  ;;  %v4481_v1 = vpack.c.bf16 %v6681_v27, %v6680_v21  ;;  %v6682_v49 = vld [vmem:[#allocation12_spill] sm:$0xff] }
  0xbc   :  { %4470 = vmatpush3.bf16.msra.mxu0 %v4469_v37  ;;  %1203 = vmatprep.mubr.f32.mxu0 %v1202_v5  ;;  %v4487_v37 = vpack.c.bf16 %v5587_v30, %v5582_v20  ;;  %v6684_v5 = vand.u32 4294901760, %v5481_v61 }
  0xbd   :  { %4462 = vmatpush3.bf16.msra.mxu1 %v4461_v56  ;;  %4472 = vmatprep.subr.bf16.mxu0 %v4471_v40  ;;  %v4479_v56 = vpack.c.bf16 %v6679_v54, %v6678_v34  ;;  %v4489_v40 = vpack.c.bf16 %v5610_v57, %v5603_v25 }
  0xbe   :  { %4464 = vmatprep.subr.bf16.mxu1 %v4463_v7  ;;  %v4491_v7 = vpack.c.bf16 %v5622_v43, %v6686_v11 }
  0xbf   :  { %1209 = vmatmul.mubr.f32.gmra.mrb[14].mxu0 %v1208_v22  ;;  %v6687_v22 = vld [vmem:[#allocation17_spill] sm:$0xff] }
  0xc0   :  { %4474 = vmatpush3.bf16.msra.mxu0 %v4473_v24  ;;  %1583 = vmatprep.mubr.f32.mxu0 %v5481_v61  ;;  %v4493_v24 = vpack.c.bf16 %v5644_v55, %v5634_v12  ;;  %v4495_v61 = vpack.c.bf16 %v5672_v60, %v5666_v29 }
  0xc1   :  { %4466 = vmatpush3.bf16.msra.mxu1 %v4465_v6  ;;  %4476 = vmatprep.subr.bf16.mxu0 %v4475_v45  ;;  %v6688_v6 = vld [vmem:[#allocation19_spill] sm:$0xff]  ;;  %v6689_v45 = vld [vmem:[#allocation22_spill] sm:$0xff] }
  0xc2   :  { %4500 = vmatprep.subr.bf16.mxu1 %v6677_v53 }
  0xc4   :  { %1441 = vmatmul.mubr.f32.vlgmr.msra.gmra.mrb[12].mxu1 %v5652_v10  ;;  %4478 = vmatpush3.bf16.msra.mxu0 %v4477_v9  ;;  %v4497_v9 = vpack.c.bf16 %v5698_v14, %v5695_v59 }
  0xc5   :  { %4502 = vmatpush3.bf16.msra.mxu1 %v6682_v49  ;;  %1446 = vmatprep.mubr.f32.mxu1 %v5661_v17 }
  0xc6   :  { %4480 = vmatprep.subr.bf16.mxu0 %v4479_v56  ;;  %4504 = vmatprep.subr.bf16.mxu1 %v6683_v63  ;;  %v6690_v56 = vld [vmem:[#allocation23_spill] sm:$0xff] }
  0xc8   :  { %1448 = vmatmul.mubr.f32.gmra.mrb[14].mxu1 %v5680_v15  ;;  %4482 = vmatpush3.bf16.msra.mxu0 %v4481_v1  ;;  %v6691_v1 = vand.u32 4294901760, %v5356_v32  ;;  %v137_v32 = vld [vmem:[#allocation5 + $0x280] sm:$0xff]  ;;  %v138_v15 = vld [vmem:[#allocation5 + $0x288] sm:$0xff] }
  0xc9   :  { %4506 = vmatpush3.bf16.msra.mxu1 %v5434_v23  ;;  %4484 = vmatprep.subr.bf16.mxu0 %v4483_v16  ;;  %v6692_v16 = vand.u32 4294901760, %v5358_v18  ;;  %v6698_v18 = vand.u32 4294901760, %v5436_v38 }
  0xca   :  { %4508 = vmatprep.subr.bf16.mxu1 %v5453_v31  ;;  %1699 = vmatprep.mubr.f32.mxu1 %v6684_v5  ;;  %v6694_v5 = vand.u32 4294901760, %v5363_v48  ;;  %v6699_v48 = vand.u32 4294901760, %v5438_v52  ;;  %v139_v52 = vld [vmem:[#allocation5 + $0x290] sm:$0xff] }
  0xcc   :  { %4486 = vmatpush3.bf16.msra.mxu0 %v4485_v4  ;;  %v4531_v4 = vpack.c.bf16 %v6692_v16, %v6691_v1  ;;  %v2057_v1 = vand.u32 4294901760, %v138_v15  ;;  %v122_v16 = vld [vmem:[#allocation5 + $0x208] sm:$0xff] }
  0xcd   :  { %4510 = vmatpush3.bf16.msra.mxu1 %v6685_v58  ;;  %4488 = vmatprep.subr.bf16.mxu0 %v4487_v37  ;;  %v6693_v37 = vld [vmem:[#allocation24_spill] sm:$0xff] }
  0xce   :  { %4512 = vmatprep.subr.bf16.mxu1 %v6687_v22 }
  0xd0   :  { %4490 = vmatpush3.bf16.msra.mxu0 %v4489_v40  ;;  %v6695_v40 = vand.u32 4294901760, %v5365_v42  ;;  %v4537_v42 = vpack.c.bf16 %v6699_v48, %v6698_v18  ;;  %v6705_v48 = vand.u32 4294901760, %v6678_v34  ;;  %v6711_v34 = vand.u32 4294901760, %v5577_v35 }
  0xd1   :  { %4514 = vmatpush3.bf16.msra.mxu1 %v6688_v6  ;;  %4492 = vmatprep.subr.bf16.mxu0 %v4491_v7  ;;  %v6717_v35 = vand.u32 4294901760, %v5610_v57  ;;  %v6722_v57 = vand.u32 4294901760, %v5644_v55 }
  0xd2   :  { %4516 = vmatprep.subr.bf16.mxu1 %v6689_v45  ;;  %v4533_v7 = vpack.c.bf16 %v6695_v40, %v6694_v5  ;;  %v2009_v40 = vand.u32 4294901760, %v122_v16 }
  0xd4   :  { %4494 = vmatpush3.bf16.msra.mxu0 %v4493_v24  ;;  %v6696_v24 = vand.u32 4294901760, %v5417_v46  ;;  %v121_v46 = vld [vmem:[#allocation5 + $0x200] sm:$0xff] }
  0xd5   :  { %4518 = vmatpush3.bf16.msra.mxu1 %v6690_v56  ;;  %4496 = vmatprep.subr.bf16.mxu0 %v4495_v61  ;;  %v6697_v61 = vand.u32 4294901760, %v5419_v51  ;;  %v6700_v51 = vand.u32 4294901760, %v5448_v50  ;;  %v2006_v38 = vand.u32 4294901760, %v121_v46 }
  0xd6   :  { %4520 = vmatprep.subr.bf16.mxu1 %v6693_v37 }
  0xd7   :  { %v4535_v41 = vpack.c.bf16 %v6697_v61, %v6696_v24  ;;  %v6702_v24 = vand.u32 4294901760, %v5465_v0  ;;  %v6703_v61 = vand.u32 4294901760, %v5467_v44  ;;  %v6707_v0 = vand.u32 4294901760, %v6680_v21 }
  0xd8   :  { %4498 = vmatpush3.bf16.msra.mxu0 %v4497_v9  ;;  %v2054_v9 = vand.u32 4294901760, %v137_v32  ;;  %v6708_v44 = vand.u32 4294901760, %v6681_v27  ;;  %v6714_v21 = vand.u32 4294901760, %v5587_v30 }
  0xd9   :  { %4522 = vmatpush3.bf16.msra.mxu1 %v5592_v39  ;;  %4532 = vmatprep.subr.bf16.mxu0 %v4531_v4  ;;  %v6701_v4 = vand.u32 4294901760, %v5458_v26  ;;  %v4541_v18 = vpack.c.bf16 %v6703_v61, %v6702_v24  ;;  %v5839_v26 = vsub.f32 %v138_v15, %v2057_v1  ;;  %v6710_v15 = vand.u32 4294901760, %v5547_v19 }
  0xda   :  { %4524 = vmatprep.subr.bf16.mxu1 %v5618_v62  ;;  %v5837_v50 = vsub.f32 %v137_v32, %v2054_v9  ;;  %v6709_v32 = vand.u32 4294901760, %v5535_v28  ;;  %v2060_v61 = vand.u32 4294901760, %v139_v52  ;;  %v5865_v28 = vsub.f32 %v122_v16, %v2009_v40 }
  0xdb   :  { %1586 = vmatmul.mubr.f32.vlgmr.msra.gmra.mrb[16].mxu0 %v5678_v47  ;;  %v4539_v5 = vpack.c.bf16 %v6701_v4, %v6700_v51  ;;  %v6706_v51 = vand.u32 4294901760, %v6679_v54  ;;  %v6712_v54 = vand.u32 4294901760, %v5580_v8  ;;  %v6715_v19 = vand.u32 4294901760, %v5678_v47 }
  0xdc   :  { %4534 = vmatpush3.bf16.msra.mxu0 %v4533_v7  ;;  %1592 = vmatprep.mubr.f32.mxu0 %v5690_v2  ;;  %v140_v7 = vld [vmem:[#allocation5 + $0x298] sm:$0xff]  ;;  %v4547_v24 = vpack.c.bf16 %v6710_v15, %v6709_v32  ;;  %v6718_v8 = vand.u32 4294901760, %v6686_v11  ;;  %v6543_v16 = vand.u32 4294901760, %v5837_v50  ;;  %v6542_v32 = vand.u32 4294901760, %v5839_v26 }
  0xdd   :  { %4526 = vmatpush3.bf16.msra.mxu1 %v5632_v13  ;;  %4536 = vmatprep.subr.bf16.mxu0 %v4535_v41  ;;  %v6704_v41 = vld [vmem:[#allocation18_spill] sm:$0xff]  ;;  %v4543_v4 = vpack.c.bf16 %v6706_v51, %v6705_v48  ;;  %v4549_v48 = vpack.c.bf16 %v6712_v54, %v6711_v34  ;;  %v5863_v51 = vsub.f32 %v121_v46, %v2006_v38  ;;  %v141_v46 = vld [vmem:[#allocation5 + $0x2a0] sm:$0xff]  ;;  %v6720_v47 = vand.u32 4294901760, %v5690_v2 }
  0xde   :  { %4528 = vmatprep.subr.bf16.mxu1 %v5711_v36  ;;  %v124_v36 = vld [vmem:[#allocation5 + $0x218] sm:$0xff]  ;;  %v6724_v11 = vand.u32 4294901760, %v5672_v60  ;;  %v6725_v2 = vand.u32 4294901760, %v5695_v59  ;;  %v5905_v55 = vsub.f32 %v139_v52, %v2060_v61  ;;  %v2066_v60 = vand.u32 4294901760, %v141_v46 }
  0xdf   :  { %1595 = vmatmul.mubr.f32.gmra.mrb[18].mxu0 %v5715_v3  ;;  %v2015_v54 = vand.u32 4294901760, %v124_v36  ;;  %v5915_v59 = vpack.c.bf16 %v2009_v40, %v2006_v38  ;;  %v143_v40 = vld [vmem:[#allocation5 + $0x2b0] sm:$0xff] }
  0xe0   :  { %4538 = vmatpush3.bf16.msra.mxu0 %v4537_v42  ;;  %1880 = vmatprep.mubr.f32.mxu0 %v6704_v41  ;;  %v4545_v42 = vpack.c.bf16 %v6708_v44, %v6707_v0  ;;  %v6716_v0 = vand.u32 4294901760, %v5603_v25  ;;  %v6721_v25 = vand.u32 4294901760, %v5634_v12 }
  0xe1   :  { %4530 = vmatpush3.bf16.msra.mxu1 %v5740_v33  ;;  %4540 = vmatprep.subr.bf16.mxu0 %v4539_v5  ;;  %v2063_v33 = vand.u32 4294901760, %v140_v7  ;;  %v123_v5 = vld [vmem:[#allocation5 + $0x210] sm:$0xff]  ;;  %6728 = vst [vmem:[#allocation11_spill] sm:$0xff] %v5915_v59 }
  0xe2   :  { %4564 = vmatprep.subr.bf16.mxu1 %v6677_v53  ;;  %v6713_v53 = vand.u32 4294901760, %v5582_v20  ;;  %v5873_v44 = vpack.c.bf16 %v6717_v35, %v6716_v0  ;;  %v6719_v20 = vand.u32 4294901760, %v5622_v43  ;;  %v6723_v43 = vand.u32 4294901760, %v5666_v29  ;;  %v142_v29 = vld [vmem:[#allocation5 + $0x2a8] sm:$0xff] }
  0xe3   :  { %v2012_v34 = vand.u32 4294901760, %v123_v5  ;;  %v6541_v0 = vand.u32 4294901760, %v5863_v51  ;;  %v5924_v52 = vpack.c.bf16 %v2063_v33, %v2060_v61  ;;  %v2069_v38 = vand.u32 4294901760, %v142_v29 }
  0xe4   :  { %v4551_v27 = vpack.c.bf16 %v6714_v21, %v6713_v53  ;;  %1703 = vmatmul.mubr.f32.vlgmr.msra.gmra.mrb[16].mxu1 %v6715_v19  ;;  %4542 = vmatpush3.bf16.msra.mxu0 %v4541_v18  ;;  %v5879_v30 = vpack.c.bf16 %v6719_v20, %v6718_v8  ;;  %v5890_v18 = vpack.c.bf16 %v6722_v57, %v6721_v25  ;;  %v125_v19 = vld [vmem:[#allocation5 + $0x220] sm:$0xff]  ;;  %v144_v20 = vld [vmem:[#allocation5 + $0x2b8] sm:$0xff] }
  0xe5   :  { %4566 = vmatpush3.bf16.msra.mxu1 %v6682_v49  ;;  %1710 = vmatprep.mubr.f32.mxu1 %v6720_v47  ;;  %v5896_v15 = vpack.c.bf16 %v6724_v11, %v6723_v43  ;;  %v6726_v49 = vand.u32 4294901760, %v5698_v14  ;;  %v5907_v53 = vsub.f32 %v140_v7, %v2063_v33  ;;  %v5909_v21 = vpack.c.bf16 %v2057_v1, %v2054_v9  ;;  %v126_v1 = vld [vmem:[#allocation5 + $0x228] sm:$0xff]  ;;  %v127_v43 = vld [vmem:[#allocation5 + $0x230] sm:$0xff] }
  0xe6   :  { %4544 = vmatprep.subr.bf16.mxu0 %v4543_v4  ;;  %4568 = vmatprep.subr.bf16.mxu1 %v6683_v63  ;;  %v6538_v4 = vand.u32 4294901760, %v5865_v28  ;;  %v6727_v63 = vand.u32 4294901760, %v5715_v3  ;;  %v2248_v14 = vsub.f32 %v5837_v50, %v6543_v16  ;;  %v2255_v9 = vsub.f32 %v5839_v26, %v6542_v32  ;;  %6729 = vst [vmem:[#allocation15_spill] sm:$0xff] %v5924_v52 }
  0xe7   :  { %v5903_v12 = vpack.c.bf16 %v6726_v49, %v6725_v2  ;;  %v5926_v7 = vsub.f32 %v123_v5, %v2012_v34  ;;  %v5928_v3 = vsub.f32 %v124_v36, %v2015_v54  ;;  %v5931_v35 = vpack.c.bf16 %v2015_v54, %v2012_v34 }
  0xe8   :  { %1714 = vmatmul.mubr.f32.gmra.mrb[18].mxu1 %v6727_v63  ;;  %4546 = vmatpush3.bf16.msra.mxu0 %v4545_v42  ;;  %v48_v42 = vld [vmem:[#allocation2 + $0x28] sm:$0xff]  ;;  %v2018_v8 = vand.u32 4294901760, %v125_v19  ;;  %v6535_v33 = vand.u32 4294901760, %v5907_v53  ;;  %v2021_v61 = vand.u32 4294901760, %v126_v1  ;;  %v2136_v36 = vsub.f32 %v5863_v51, %v6541_v0 }
  0xe9   :  { %4570 = vmatpush3.bf16.msra.mxu1 %v5434_v23  ;;  %4548 = vmatprep.subr.bf16.mxu0 %v4547_v24  ;;  %6730 = vst [vmem:[#allocation16_spill] sm:$0xff] %v5931_v35  ;;  %v6532_v23 = vand.u32 4294901760, %v5905_v55  ;;  %v5936_v24 = vsub.f32 %v141_v46, %v2066_v60  ;;  %v2249_v5 = vand.u32 4294901760, %v2248_v14  ;;  %v2072_v47 = vand.u32 4294901760, %v143_v40 }
  0xea   :  { %4572 = vmatprep.subr.bf16.mxu1 %v5453_v31  ;;  %1991 = vmatprep.mubr.f32.mxu1 %v6704_v41  ;;  %v2143_v31 = vsub.f32 %v5865_v28, %v6538_v4  ;;  %v2256_v41 = vand.u32 4294901760, %v2255_v9  ;;  %v5944_v25 = vand.u32 4294901760, %v48_v42  ;;  %v5947_v46 = vpack.c.bf16 %v2069_v38, %v2066_v60  ;;  %v145_v9 = vld [vmem:[#allocation5 + $0x2c0] sm:$0xff] }
  0xeb   :  { %v2075_v57 = vand.u32 4294901760, %v144_v20  ;;  %v6533_v11 = vand.u32 4294901760, %v5926_v7  ;;  %v6534_v34 = vand.u32 4294901760, %v5928_v3  ;;  %v5952_v54 = vsub.f32 %v142_v29, %v2069_v38  ;;  %v146_v38 = vld [vmem:[#allocation5 + $0x2c8] sm:$0xff] }
  0xec   :  { %4550 = vmatpush3.bf16.msra.mxu0 %v4549_v48  ;;  %6731 = vst [vmem:[#allocation20_spill] sm:$0xff] %v5944_v25  ;;  %6732 = vst [vmem:[#allocation21_spill] sm:$0xff] %v5947_v46  ;;  %v5954_v48 = vsub.f32 %v125_v19, %v2018_v8  ;;  %v2262_v2 = vsub.f32 %v5905_v55, %v6532_v23  ;;  %v5962_v49 = vpack.c.bf16 %v2021_v61, %v2018_v8 }
  0xed   :  { %4574 = vmatpush3.bf16.msra.mxu1 %v6685_v58  ;;  %4552 = vmatprep.subr.bf16.mxu0 %v4551_v27  ;;  %v2269_v58 = vsub.f32 %v5907_v53, %v6535_v33  ;;  %v128_v27 = vld [vmem:[#allocation5 + $0x238] sm:$0xff]  ;;  %v5964_v60 = vsub.f32 %v126_v1, %v2021_v61  ;;  %v2137_v63 = vand.u32 4294901760, %v2136_v36  ;;  %v2144_v14 = vand.u32 4294901760, %v2143_v31 }
  0xee   :  { %4576 = vmatprep.subr.bf16.mxu1 %v6687_v22  ;;  %6733 = vst [vmem:[#allocation12_spill] sm:$0xff] %v5962_v49  ;;  %v5967_v22 = vpack.c.bf16 %v2256_v41, %v2249_v5  ;;  %v5969_v29 = vsub.f32 %v143_v40, %v2072_v47  ;;  %v2024_v19 = vand.u32 4294901760, %v127_v43  ;;  %v5972_v23 = vsub.f32 %v48_v42, %v5944_v25 }
  0xef   :  { %v5976_v1 = vpack.c.bf16 %v2075_v57, %v2072_v47  ;;  %v2027_v8 = vand.u32 4294901760, %v128_v27  ;;  %v2157_v40 = vsub.f32 %v5928_v3, %v6534_v34  ;;  %v2263_v61 = vand.u32 4294901760, %v2262_v2  ;;  %v129_v47 = vld [vmem:[#allocation5 + $0x240] sm:$0xff]  ;;  %v130_v34 = vld [vmem:[#allocation5 + $0x248] sm:$0xff] }
  0xf0   :  { %4554 = vmatpush3.bf16.msra.mxu0 %v5873_v44  ;;  %v2150_v44 = vsub.f32 %v5926_v7, %v6533_v11  ;;  %v2270_v42 = vand.u32 4294901760, %v2269_v58  ;;  %v6537_v36 = vand.u32 4294901760, %v5936_v24  ;;  %v5989_v31 = vsub.f32 %v144_v20, %v2075_v57 }
  0xf1   :  { %4578 = vmatpush3.bf16.msra.mxu1 %v6688_v6  ;;  %4556 = vmatprep.subr.bf16.mxu0 %v5879_v30  ;;  %6734 = vst [vmem:[#allocation13_spill] sm:$0xff] %v5976_v1  ;;  %v6536_v6 = vand.u32 4294901760, %v5952_v54  ;;  %v5987_v30 = vpack.c.bf16 %v2144_v14, %v2137_v63  ;;  %v2078_v5 = vand.u32 4294901760, %v145_v9  ;;  %v2081_v41 = vand.u32 4294901760, %v146_v38 }
  0xf2   :  { %4580 = vmatprep.subr.bf16.mxu1 %v6689_v45  ;;  %6735 = vst [vmem:[#allocation14_spill] sm:$0xff] %v5989_v31  ;;  %v5992_v11 = vsub.f32 %v127_v43, %v2024_v19  ;;  %v6539_v45 = vand.u32 4294901760, %v5954_v48  ;;  %v6540_v2 = vand.u32 4294901760, %v5964_v60  ;;  %v6544_v58 = vand.u32 4294901760, %v5972_v23 }
  0xf3   :  { %v5999_v20 = vpack.c.bf16 %v2027_v8, %v2024_v19  ;;  %v6001_v57 = vsub.f32 %v128_v27, %v2027_v8  ;;  %v2151_v63 = vand.u32 4294901760, %v2150_v44  ;;  %v2158_v14 = vand.u32 4294901760, %v2157_v40  ;;  %v147_v27 = vld [vmem:[#allocation5 + $0x2d0] sm:$0xff]  ;;  %v148_v8 = vld [vmem:[#allocation5 + $0x2d8] sm:$0xff] }
  0xf4   :  { %4558 = vmatpush3.bf16.msra.mxu0 %v5890_v18  ;;  %6736 = vst [vmem:[#allocation25_spill] sm:$0xff] %v5992_v11  ;;  %v6004_v18 = vpack.c.bf16 %v2270_v42, %v2263_v61  ;;  %v2276_v43 = vsub.f32 %v5936_v24, %v6537_v36  ;;  %v2030_v33 = vand.u32 4294901760, %v129_v47  ;;  %v2033_v19 = vand.u32 4294901760, %v130_v34 }
  0xf5   :  { %4582 = vmatpush3.bf16.msra.mxu1 %v6690_v56  ;;  %4560 = vmatprep.subr.bf16.mxu0 %v5896_v15  ;;  %6737 = vst [vmem:[#allocation17_spill] sm:$0xff] %v5999_v20  ;;  %6738 = vst [vmem:[#allocation19_spill] sm:$0xff] %v6001_v57  ;;  %v2283_v56 = vsub.f32 %v5952_v54, %v6536_v6  ;;  %v6012_v15 = vpack.c.bf16 %v2081_v41, %v2078_v5  ;;  %v6546_v44 = vand.u32 4294901760, %v5969_v29 }
  0xf6   :  { %4584 = vmatprep.subr.bf16.mxu1 %v6693_v37  ;;  %v6545_v37 = vand.u32 4294901760, %v5989_v31  ;;  %v2164_v40 = vsub.f32 %v5954_v48, %v6539_v45  ;;  %v2171_v61 = vsub.f32 %v5964_v60, %v6540_v2  ;;  %v6547_v42 = vand.u32 4294901760, %v5992_v11 }
  0xf7   :  { %6739 = vst [vmem:[#allocation22_spill] sm:$0xff] %v6012_v15  ;;  %v2104_v6 = vsub.f32 %v5972_v23, %v6544_v58  ;;  %v6029_v36 = vpack.c.bf16 %v2158_v14, %v2151_v63  ;;  %v6033_v4 = vsub.f32 %v146_v38, %v2081_v41  ;;  %v6552_v45 = vand.u32 4294901760, %v6001_v57 }
  0xf8   :  { %4562 = vmatpush3.bf16.msra.mxu0 %v5903_v12  ;;  %v6031_v12 = vsub.f32 %v145_v9, %v2078_v5  ;;  %v2277_v2 = vand.u32 4294901760, %v2276_v43  ;;  %v2284_v0 = vand.u32 4294901760, %v2283_v56  ;;  %v2084_v32 = vand.u32 4294901760, %v147_v27  ;;  %v131_v5 = vld [vmem:[#allocation5 + $0x250] sm:$0xff]  ;;  %v149_v56 = vld [vmem:[#allocation5 + $0x2e0] sm:$0xff] }
  0xf9   :  { %4586 = vmatpush3.bf16.msra.mxu1 %v5592_v39  ;;  %4596 = vmatprep.subr.bf16.mxu0 %v5909_v21  ;;  %v2087_v16 = vand.u32 4294901760, %v148_v8  ;;  %v6038_v58 = vpack.c.bf16 %v2033_v19, %v2030_v33  ;;  %v6040_v39 = vsub.f32 %v129_v47, %v2030_v33  ;;  %v2290_v9 = vsub.f32 %v5969_v29, %v6546_v44  ;;  %v6741_v44 = vld [vmem:[#allocation27_spill] sm:$0xff] }
  0xfa   :  { %4588 = vmatprep.subr.bf16.mxu1 %v5618_v62  ;;  %v2297_v38 = vsub.f32 %v5989_v31, %v6545_v37  ;;  %v132_v62 = vld [vmem:[#allocation5 + $0x258] sm:$0xff]  ;;  %v2165_v41 = vand.u32 4294901760, %v2164_v40  ;;  %v2172_v63 = vand.u32 4294901760, %v2171_v61  ;;  %v2178_v33 = vsub.f32 %v5992_v11, %v6547_v42  ;;  %v150_v37 = vld [vmem:[#allocation5 + $0x2e8] sm:$0xff]  ;;  %v133_v11 = vld [vmem:[#allocation5 + $0x260] sm:$0xff] }
  0xfb   :  { %1882 = vmatmul.mubr.f32.vlgmr.msra.gmra.mrb[20].mxu0 %v5652_v10  ;;  %6740 = vst [vmem:[#allocation23_spill] sm:$0xff] %v6038_v58  ;;  %v2105_v47 = vand.u32 4294901760, %v2104_v6  ;;  %v6055_v14 = vsub.f32 %v130_v34, %v2033_v19  ;;  %v2185_v43 = vsub.f32 %v6001_v57, %v6552_v45  ;;  %v6063_v42 = vpack.c.bf16 %v2284_v0, %v2277_v2  ;;  %v6743_v34 = vld [vmem:[#allocation26_spill] sm:$0xff]  ;;  %v134_v40 = vld [vmem:[#allocation5 + $0x268] sm:$0xff] }
  0xfc   :  { %4598 = vmatpush3.bf16.msra.mxu0 %v5915_v59  ;;  %1887 = vmatprep.mubr.f32.mxu0 %v5661_v17  ;;  %v6065_v6 = vpack.c.bf16 %v2087_v16, %v2084_v32  ;;  %v6068_v19 = vsub.f32 %v147_v27, %v2084_v32  ;;  %v6070_v59 = vsub.f32 %v148_v8, %v2087_v16  ;;  %v2291_v45 = vand.u32 4294901760, %v2290_v9  ;;  %v6744_v31 = vld [vmem:[#allocation28_spill] sm:$0xff] }
  0xfd   :  { %4590 = vmatpush3.bf16.msra.mxu1 %v5632_v13  ;;  %4600 = vmatprep.subr.bf16.mxu0 %v5924_v52  ;;  %v2036_v13 = vand.u32 4294901760, %v131_v5  ;;  %v2039_v52 = vand.u32 4294901760, %v132_v62  ;;  %v2298_v57 = vand.u32 4294901760, %v2297_v38  ;;  %v6073_v61 = vpack.c.bf16 %v2172_v63, %v2165_v41 }
  0xfe   :  { %4592 = vmatprep.subr.bf16.mxu1 %v6741_v44  ;;  %6742 = vst [vmem:[#allocation24_spill] sm:$0xff] %v6065_v6  ;;  %v2179_v0 = vand.u32 4294901760, %v2178_v33  ;;  %v2090_v2 = vand.u32 4294901760, %v149_v56  ;;  %v2093_v44 = vand.u32 4294901760, %v150_v37  ;;  %v2186_v32 = vand.u32 4294901760, %v2185_v43 }
  0xff   :  { %1889 = vmatmul.mubr.f32.gmra.mrb[22].mxu0 %v6743_v34  ;;  %v6745_v16 = vand.u32 4294901760, %v6031_v12  ;;  %v6746_v8 = vand.u32 4294901760, %v6033_v4  ;;  %v6563_v38 = vand.u32 4294901760, %v6040_v39  ;;  %v6085_v41 = vpack.c.bf16 %v2039_v52, %v2036_v13 }
 0x100   :  { %4602 = vmatpush3.bf16.msra.mxu0 %v5931_v35  ;;  %2106 = vmatprep.mubr.f32.mxu0 %v2105_v47  ;;  %v6087_v63 = vsub.f32 %v131_v5, %v2036_v13  ;;  %v2045_v33 = vand.u32 4294901760, %v134_v40  ;;  %v6089_v47 = vpack.c.bf16 %v2298_v57, %v2291_v45  ;;  %v6091_v43 = vsub.f32 %v132_v62, %v2039_v52  ;;  %v6096_v35 = vld [vmem:[#allocation5 + $0x2f8] sm:$0xff]  ;;  %v47_v57 = vld [vmem:[#allocation2 + $0x20] sm:$0xff] }
 0x101   :  { %4594 = vmatpush3.bf16.msra.mxu1 %v6744_v31  ;;  %4604 = vmatprep.subr.bf16.mxu0 %v5947_v46  ;;  %v2304_v27 = vsub.f32 %v6031_v12, %v6745_v16  ;;  %v2311_v9 = vsub.f32 %v6033_v4, %v6746_v8  ;;  %v2042_v31 = vand.u32 4294901760, %v133_v11  ;;  %v6094_v46 = vld [vmem:[#allocation5 + $0x2f0] sm:$0xff]  ;;  %v6103_v5 = vsub.f32 %v149_v56, %v2090_v2 }
 0x102   :  { %4628 = vmatprep.subr.bf16.mxu1 %v5967_v22  ;;  %v6101_v22 = vpack.c.bf16 %v2093_v44, %v2090_v2  ;;  %v6105_v45 = vsub.f32 %v150_v37, %v2093_v44  ;;  %v6568_v52 = vand.u32 4294901760, %v6070_v59  ;;  %v6110_v62 = vpack.c.bf16 %v2186_v32, %v2179_v0  ;;  %v55_v16 = vld [vmem:[#allocation2 + $0x60] sm:$0xff]  ;;  %v6125_v2 = vld [vmem:[#allocation5 + $0x278] sm:$0xff] }
 0x103   :  { %6747 = vst [vmem:[#allocation18_spill] sm:$0xff] %v6103_v5  ;;  %v2305_v13 = vand.u32 4294901760, %v2304_v27  ;;  %v2312_v8 = vand.u32 4294901760, %v2311_v9  ;;  %v6117_v37 = vpack.c.bf16 %v2045_v33, %v2042_v31  ;;  %v6119_v56 = vsub.f32 %v133_v11, %v2042_v31  ;;  %v6123_v0 = vld [vmem:[#allocation5 + $0x270] sm:$0xff] }
 0x104   :  { %1993 = vmatmul.mubr.f32.vlgmr.msra.gmra.mrb[20].mxu1 %v5652_v10  ;;  %4606 = vmatpush3.bf16.msra.mxu0 %v5962_v49  ;;  %v2192_v10 = vsub.f32 %v6040_v39, %v6563_v38  ;;  %v6127_v44 = vsub.f32 %v134_v40, %v2045_v33  ;;  %v6748_v32 = vand.u32 4294901760, %v6055_v14  ;;  %v6135_v11 = vand.u32 4294901760, %v47_v57 }
 0x105   :  { %4630 = vmatpush3.bf16.msra.mxu1 %v5987_v30  ;;  %1998 = vmatprep.mubr.f32.mxu1 %v5661_v17  ;;  %v2096_v30 = vand.u32 4294901760, %v6094_v46  ;;  %v2099_v17 = vand.u32 4294901760, %v6096_v35  ;;  %v2325_v31 = vsub.f32 %v6070_v59, %v6568_v52  ;;  %v6144_v38 = vand.u32 4294901760, %v55_v16 }
 0x106   :  { %4608 = vmatprep.subr.bf16.mxu0 %v5976_v1  ;;  %4632 = vmatprep.subr.bf16.mxu1 %v6004_v18  ;;  %v2199_v27 = vsub.f32 %v6055_v14, %v6748_v32  ;;  %v6749_v18 = vand.u32 4294901760, %v6068_v19  ;;  %6750 = vst [vmem:[#allocation27_spill] sm:$0xff] %v6135_v11  ;;  %v54_v32 = vld [vmem:[#allocation2 + $0x58] sm:$0xff]  ;;  %v2193_v1 = vand.u32 4294901760, %v2192_v10  ;;  %v6161_v10 = vsub.f32 %v47_v57, %v6135_v11 }
 0x107   :  { %6751 = vst [vmem:[#allocation26_spill] sm:$0xff] %v6144_v38  ;;  %v6152_v52 = vsub.f32 %v6094_v46, %v2096_v30  ;;  %v6155_v33 = vsub.f32 %v6096_v35, %v2099_v17  ;;  %v2326_v46 = vand.u32 4294901760, %v2325_v31  ;;  %v6754_v40 = vand.u32 4294901760, %v6091_v43 }
 0x108   :  { %v2318_v9 = vsub.f32 %v6068_v19, %v6749_v18  ;;  %2000 = vmatmul.mubr.f32.gmra.mrb[22].mxu1 %v6743_v34  ;;  %4610 = vmatpush3.bf16.msra.mxu0 %v5999_v20  ;;  %v4643_v18 = vpack.c.bf16 %v2312_v8, %v2305_v13  ;;  %v2048_v34 = vand.u32 4294901760, %v6123_v0  ;;  %v2051_v20 = vand.u32 4294901760, %v6125_v2 }
 0x109   :  { %4634 = vmatpush3.bf16.msra.mxu1 %v6029_v36  ;;  %4612 = vmatprep.subr.bf16.mxu0 %v6012_v15  ;;  %v2200_v8 = vand.u32 4294901760, %v2199_v27  ;;  %v6163_v15 = vand.u32 4294901760, %v54_v32  ;;  %v2213_v36 = vsub.f32 %v6091_v43, %v6754_v40  ;;  %v6756_v40 = vand.u32 4294901760, %v6103_v5 }
 0x10a   :  { %4636 = vmatprep.subr.bf16.mxu1 %v6063_v42  ;;  %2357 = vmatprep.mubr.f32.mxu1 %v5944_v25  ;;  %v2319_v13 = vand.u32 4294901760, %v2318_v9  ;;  %v6753_v42 = vand.u32 4294901760, %v6087_v63  ;;  %v6173_v25 = vsub.f32 %v55_v16, %v6144_v38  ;;  %v6178_v57 = vsub.f32 %v6123_v0, %v2048_v34 }
 0x10b   :  { %6752 = vst [vmem:[#allocation28_spill] sm:$0xff] %v6163_v15  ;;  %v6181_v27 = vsub.f32 %v6125_v2, %v2051_v20  ;;  %v2332_v16 = vsub.f32 %v6103_v5, %v6756_v40  ;;  %v6582_v0 = vand.u32 4294901760, %v6152_v52  ;;  %v4645_v2 = vpack.c.bf16 %v2200_v8, %v2193_v1 }
 0x10c   :  { %4614 = vmatpush3.bf16.msra.mxu0 %v6038_v58  ;;  %v2206_v35 = vsub.f32 %v6087_v63, %v6753_v42  ;;  %v6194_v58 = vpack.c.bf16 %v2099_v17, %v2096_v30  ;;  %v6583_v9 = vand.u32 4294901760, %v6161_v10  ;;  %v6198_v31 = vsub.f32 %v54_v32, %v6163_v15 }
 0x10d   :  { %4638 = vmatpush3.bf16.msra.mxu1 %v6073_v61  ;;  %4616 = vmatprep.subr.bf16.mxu0 %v6065_v6  ;;  %6755 = vst [vmem:[#allocation29_spill] sm:$0xff] %v6181_v27  ;;  %v6757_v61 = vand.u32 4294901760, %v6105_v45  ;;  %v6581_v6 = vand.u32 4294901760, %v6155_v33  ;;  %v2214_v5 = vand.u32 4294901760, %v2213_v36  ;;  %v6584_v49 = vand.u32 4294901760, %v6173_v25 }
 0x10e   :  { %4640 = vmatprep.subr.bf16.mxu1 %v6089_v47  ;;  %v4647_v47 = vpack.c.bf16 %v2326_v46, %v2319_v13  ;;  %v2207_v40 = vand.u32 4294901760, %v2206_v35  ;;  %v6758_v1 = vand.u32 4294901760, %v6119_v56  ;;  %v6759_v17 = vand.u32 4294901760, %v6127_v44 }
 0x10f   :  { %v2339_v42 = vsub.f32 %v6105_v45, %v6757_v61  ;;  %v6585_v8 = vand.u32 4294901760, %v6178_v57  ;;  %v6586_v13 = vand.u32 4294901760, %v6181_v27  ;;  %v2333_v36 = vand.u32 4294901760, %v2332_v16 }
 0x110   :  { %4618 = vmatpush3.bf16.msra.mxu0 %v6085_v41  ;;  %v2220_v30 = vsub.f32 %v6119_v56, %v6758_v1  ;;  %v2227_v32 = vsub.f32 %v6127_v44, %v6759_v17  ;;  %v2353_v35 = vsub.f32 %v6155_v33, %v6581_v6  ;;  %v2110_v61 = vsub.f32 %v6161_v10, %v6583_v9 }
 0x111   :  { %4642 = vmatpush3.bf16.msra.mxu1 %v6110_v62  ;;  %4620 = vmatprep.subr.bf16.mxu0 %v6101_v22  ;;  %v2340_v46 = vand.u32 4294901760, %v2339_v42  ;;  %v2346_v62 = vsub.f32 %v6152_v52, %v6582_v0  ;;  %v6223_v17 = vpack.c.bf16 %v2051_v20, %v2048_v34  ;;  %v4659_v16 = vpack.c.bf16 %v5839_v26, %v5837_v50 }
 0x112   :  { %4644 = vmatprep.subr.bf16.mxu1 %v4643_v18  ;;  %v4649_v18 = vpack.c.bf16 %v2214_v5, %v2207_v40  ;;  %v2119_v42 = vsub.f32 %v6173_v25, %v6584_v49  ;;  %v2221_v6 = vand.u32 4294901760, %v2220_v30  ;;  %v2228_v0 = vand.u32 4294901760, %v2227_v32 }
 0x113   :  { %v2234_v9 = vsub.f32 %v6178_v57, %v6585_v8  ;;  %v2241_v20 = vsub.f32 %v6181_v27, %v6586_v13  ;;  %v4651_v5 = vpack.c.bf16 %v2340_v46, %v2333_v36  ;;  %v2347_v34 = vand.u32 4294901760, %v2346_v62 }
 0x114   :  { %4622 = vmatpush3.bf16.msra.mxu0 %v6117_v37  ;;  %v2354_v40 = vand.u32 4294901760, %v2353_v35  ;;  %v2111_v1 = vand.u32 4294901760, %v2110_v61  ;;  %v6760_v49 = vand.u32 4294901760, %v6198_v31  ;;  %v4661_v30 = vpack.c.bf16 %v5865_v28, %v5863_v51 }
 0x115   :  { %4646 = vmatpush3.bf16.msra.mxu1 %v4645_v2  ;;  %4624 = vmatprep.subr.bf16.mxu0 %v6194_v58  ;;  %v2120_v32 = vand.u32 4294901760, %v2119_v42  ;;  %v4653_v8 = vpack.c.bf16 %v2228_v0, %v2221_v6  ;;  %v2235_v36 = vand.u32 4294901760, %v2234_v9  ;;  %v2242_v46 = vand.u32 4294901760, %v2241_v20  ;;  %v6761_v0 = vld [vmem:[#allocation14_spill] sm:$0xff]  ;;  %v6764_v42 = vld [vmem:[#allocation11_spill] sm:$0xff] }
 0x116   :  { %4648 = vmatprep.subr.bf16.mxu1 %v4647_v47  ;;  %v2125_v2 = vsub.f32 %v6198_v31, %v6760_v49  ;;  %v4663_v47 = vpack.c.bf16 %v5907_v53, %v5905_v55  ;;  %v4655_v62 = vpack.c.bf16 %v2354_v40, %v2347_v34  ;;  %v4665_v49 = vpack.c.bf16 %v5928_v3, %v5926_v7  ;;  %v6766_v40 = vld [vmem:[#allocation16_spill] sm:$0xff] }
 0x117   :  { %v4657_v61 = vpack.c.bf16 %v2242_v46, %v2235_v36  ;;  %v4667_v6 = vpack.c.bf16 %v5952_v54, %v5936_v24  ;;  %v4669_v9 = vpack.c.bf16 %v5964_v60, %v5954_v48  ;;  %v4675_v20 = vpack.c.bf16 %v6033_v4, %v6031_v12  ;;  %v6769_v36 = vld [vmem:[#allocation12_spill] sm:$0xff]  ;;  %v6770_v46 = vld [vmem:[#allocation18_spill] sm:$0xff] }
 0x118   :  { %4626 = vmatpush3.bf16.msra.mxu0 %v6223_v17  ;;  %v2126_v35 = vand.u32 4294901760, %v2125_v2  ;;  %v4677_v34 = vpack.c.bf16 %v6055_v14, %v6040_v39  ;;  %v4679_v2 = vpack.c.bf16 %v6070_v59, %v6068_v19 }
 0x119   :  { %4650 = vmatpush3.bf16.msra.mxu1 %v4649_v18  ;;  %4660 = vmatprep.subr.bf16.mxu0 %v4659_v16  ;;  %v6763_v18 = vld [vmem:[#allocation19_spill] sm:$0xff] }
 0x11a   :  { %4652 = vmatprep.subr.bf16.mxu1 %v4651_v5  ;;  %v6765_v5 = vld [vmem:[#allocation15_spill] sm:$0xff] }
 0x11b   :  { %2112 = vmatmul.mubr.f32.vlgmr.msra.gmra.mrb[24].mxu0 %v2111_v1  ;;  %v6762_v1 = vld [vmem:[#allocation25_spill] sm:$0xff] }
 0x11c   :  { %4662 = vmatpush3.bf16.msra.mxu0 %v4661_v30  ;;  %2121 = vmatprep.mubr.f32.mxu0 %v2120_v32  ;;  %v4673_v16 = vpack.c.bf16 %v6763_v18, %v6762_v1  ;;  %v6767_v30 = vld [vmem:[#allocation21_spill] sm:$0xff]  ;;  %v6768_v32 = vand.u32 4294901760, %v5972_v23 }
 0x11d   :  { %4654 = vmatpush3.bf16.msra.mxu1 %v4653_v8  ;;  %4664 = vmatprep.subr.bf16.mxu0 %v4663_v47  ;;  %v4671_v8 = vpack.c.bf16 %v6761_v0, %v5969_v29  ;;  %v4681_v47 = vpack.c.bf16 %v6091_v43, %v6087_v63 }
 0x11e   :  { %4656 = vmatprep.subr.bf16.mxu1 %v4655_v62  ;;  %v4683_v62 = vpack.c.bf16 %v6105_v45, %v6770_v46 }
 0x11f   :  { %2127 = vmatmul.mubr.f32.gmra.mrb[26].mxu0 %v2126_v35  ;;  %v6771_v35 = vld [vmem:[#allocation13_spill] sm:$0xff] }
 0x120   :  { %4666 = vmatpush3.bf16.msra.mxu0 %v4665_v49  ;;  %2501 = vmatprep.mubr.f32.mxu0 %v5972_v23 }
 0x121   :  { %4658 = vmatpush3.bf16.msra.mxu1 %v4657_v61  ;;  %4668 = vmatprep.subr.bf16.mxu0 %v4667_v6  ;;  %v4685_v6 = vpack.c.bf16 %v6127_v44, %v6119_v56 }
 0x122   :  { %4692 = vmatprep.subr.bf16.mxu1 %v5909_v21 }
 0x124   :  { %2359 = vmatmul.mubr.f32.vlgmr.msra.gmra.mrb[24].mxu1 %v6135_v11  ;;  %4670 = vmatpush3.bf16.msra.mxu0 %v4669_v9  ;;  %v6772_v9 = vld [vmem:[#allocation17_spill] sm:$0xff] }
 0x125   :  { %4694 = vmatpush3.bf16.msra.mxu1 %v6764_v42  ;;  %2364 = vmatprep.mubr.f32.mxu1 %v6144_v38  ;;  %v6779_v38 = vand.u32 4294901760, %v5865_v28  ;;  %v6783_v28 = vand.u32 4294901760, %v5928_v3  ;;  %v6786_v3 = vand.u32 4294901760, %v5954_v48  ;;  %v6792_v48 = vand.u32 4294901760, %v6762_v1 }
 0x126   :  { %4672 = vmatprep.subr.bf16.mxu0 %v4671_v8  ;;  %4696 = vmatprep.subr.bf16.mxu1 %v6765_v5  ;;  %v4687_v8 = vpack.c.bf16 %v6155_v33, %v6152_v52  ;;  %v6798_v1 = vand.u32 4294901760, %v6040_v39  ;;  %v6803_v39 = vand.u32 4294901760, %v6091_v43 }
 0x128   :  { %2366 = vmatmul.mubr.f32.gmra.mrb[26].mxu1 %v6163_v15  ;;  %4674 = vmatpush3.bf16.msra.mxu0 %v4673_v16  ;;  %v6773_v16 = vld [vmem:[#allocation22_spill] sm:$0xff]  ;;  %v6778_v15 = vand.u32 4294901760, %v5863_v51  ;;  %v6782_v51 = vand.u32 4294901760, %v5926_v7 }
 0x129   :  { %4698 = vmatpush3.bf16.msra.mxu1 %v6766_v40  ;;  %4676 = vmatprep.subr.bf16.mxu0 %v4675_v20  ;;  %v3458_v20 = vld [vmem:[%s6425_s2] ss:$0 sm:$0xff]  ;;  %s4916_s2 = smov [#allocation7]  }
 0x12a   :  { %4700 = vmatprep.subr.bf16.mxu1 %v6767_v30  ;;  %2617 = vmatprep.mubr.f32.mxu1 %v6768_v32  ;;  %v6775_v32 = vand.u32 4294901760, %v5837_v50  ;;  %v4725_v11 = vpack.c.bf16 %v6779_v38, %v6778_v15  ;;  %v6780_v50 = vand.u32 4294901760, %v5905_v55  ;;  %v4729_v15 = vpack.c.bf16 %v6783_v28, %v6782_v51  ;;  %v154_v51 = vld [vmem:[#allocation5 + $0x308] sm:$0xff]  ;;  %s3445_s13 = sshll.u32 %s4916_s2, 4  ;;  %s3446_s13 = int_to_ptr.vmem [resolvable:$true] %s3445_s13 }
 0x12b   :  { %v6784_v55 = vand.u32 4294901760, %v5936_v24  ;;  %s4882_s14 = scalar_lea.vmem %s3446_s13, 256  ;;  %p4887_p3 = scmp.lt.s32.totalorder %s3446_s13, %s3446_s13 }
 0x12c   :  { %4678 = vmatpush3.bf16.msra.mxu0 %v4677_v34  ;;  %v4689_v34 = vpack.c.bf16 %v6181_v27, %v6178_v57  ;;  %p4883_p2 = scmp.ne.s32.totalorder %s3446_s13, %s4882_s14  ;;  %p4888_p4 = scmp.lt.s32.totalorder %s4882_s14, %s4882_s14 }
 0x12d   :  { %4702 = vmatpush3.bf16.msra.mxu1 %v6769_v36  ;;  %4680 = vmatprep.subr.bf16.mxu0 %v4679_v2  ;;  %v6774_v2 = vld [vmem:[#allocation23_spill] sm:$0xff] }
 0x12e   :  { %4704 = vmatprep.subr.bf16.mxu1 %v6771_v35  ;;  %v3493_v49 = vpop.f32.mrb[0].mxu0  ;;  %p4889_p5 = por %p4888_p4, %p4887_p3 }
 0x12f   :  { %v3494_v61 = vpop.f32.mrb[1].mxu0 }
 0x130   :  { %4682 = vmatpush3.bf16.msra.mxu0 %v4681_v47  ;;  %v3495_v23 = vadd.f32 %v3494_v61, %v3493_v49  ;;  %v6776_v47 = vand.u32 4294901760, %v5839_v26  ;;  %v6777_v49 = vld [vmem:[#allocation24_spill] sm:$0xff]  ;;  %v6781_v26 = vand.u32 4294901760, %v5907_v53  ;;  %v6785_v53 = vand.u32 4294901760, %v5952_v54  ;;  %p4890_p6 = pnand %p4889_p5, %p4883_p2 }
 0x131   :  { %4706 = vmatpush3.bf16.msra.mxu1 %v6772_v9  ;;  %4684 = vmatprep.subr.bf16.mxu0 %v4683_v62  ;;  %v6789_v54 = vand.u32 4294901760, %v5969_v29  ;;  %v6796_v29 = vand.u32 4294901760, %v6033_v4  ;;  %v6801_v4 = vand.u32 4294901760, %v6070_v59  ;;  %v6805_v59 = vand.u32 4294901760, %v6105_v45 }
 0x132   :  { %4708 = vmatprep.subr.bf16.mxu1 %v6773_v16  ;;  %v4723_v62 = vpack.c.bf16 %v6776_v47, %v6775_v32  ;;  %v278_v61 = vadd.f32 %v3495_v23, %v3458_v20  ;;  %v6787_v47 = vand.u32 4294901760, %v5964_v60  ;;  %v6793_v60 = vand.u32 4294901760, %v6763_v18 }
 0x133   :  { %v6799_v18 = vand.u32 4294901760, %v6055_v14  ;;  %v153_v14 = vld [vmem:[#allocation5 + $0x300] sm:$0xff]  ;;  %v6808_v45 = vand.u32 4294901760, %v6152_v52  ;;  %v6810_v52 = vand.u32 4294901760, %v6178_v57 }
 0x134   :  { %4686 = vmatpush3.bf16.msra.mxu0 %v4685_v6 }
 0x135   :  { %4710 = vmatpush3.bf16.msra.mxu1 %v6774_v2  ;;  %4688 = vmatprep.subr.bf16.mxu0 %v4687_v8  ;;  %v4727_v8 = vpack.c.bf16 %v6781_v26, %v6780_v50 }
 0x136   :  { %4712 = vmatprep.subr.bf16.mxu1 %v6777_v49 }
 0x137   :  { %v3531_v13 = vpop.f32.mrb[0].mxu1 }
 0x138   :  { %v3532_v6 = vpop.f32.mrb[1].mxu1  ;;  %4690 = vmatpush3.bf16.msra.mxu0 %v4689_v34 }
 0x139   :  { %v3533_v27 = vadd.f32 %v3532_v6, %v3531_v13  ;;  %4714 = vmatpush3.bf16.msra.mxu1 %v6085_v41  ;;  %4724 = vmatprep.subr.bf16.mxu0 %v4723_v62  ;;  %v4733_v62 = vpack.c.bf16 %v6787_v47, %v6786_v3  ;;  %v6790_v6 = vand.u32 4294901760, %v6761_v0  ;;  %v6811_v3 = vld [vmem:[#allocation29_spill] sm:$0xff] }
 0x13a   :  { %4716 = vmatprep.subr.bf16.mxu1 %v6101_v22 }
 0x13b   :  { %v6305_v23 = vadd.f32 %v3533_v27, %v278_v61  ;;  %2504 = vmatmul.mubr.f32.vlgmr.msra.gmra.mrb[28].mxu0 %v6161_v10  ;;  %v3534_v34 = vpop.f32.mrb[2].mxu1  ;;  %v4731_v27 = vpack.c.bf16 %v6785_v53, %v6784_v55  ;;  %v6788_v61 = vld [vmem:[#allocation20_spill] sm:$0xff]  ;;  %v4735_v50 = vpack.c.bf16 %v6790_v6, %v6789_v54  ;;  %v6806_v55 = vand.u32 4294901760, %v6119_v56 }
 0x13c   :  { %4726 = vmatpush3.bf16.msra.mxu0 %v4725_v11  ;;  %2510 = vmatprep.mubr.f32.mxu0 %v6173_v25  ;;  %v3535_v38 = vpop.f32.mrb[3].mxu1 }
 0x13d   :  { %4718 = vmatpush3.bf16.msra.mxu1 %v6117_v37  ;;  %4728 = vmatprep.subr.bf16.mxu0 %v4727_v8  ;;  %v3496_v13 = vpop.f32.mrb[2].mxu0  ;;  %v3536_v32 = vadd.f32 %v3535_v38, %v3534_v34  ;;  %v6791_v8 = vand.u32 4294901760, %v6161_v10  ;;  %v4737_v34 = vpack.c.bf16 %v6793_v60, %v6792_v48  ;;  %v6797_v10 = vand.u32 4294901760, %v6198_v31 }
 0x13e   :  { %4720 = vmatprep.subr.bf16.mxu1 %v6194_v58  ;;  %v3497_v11 = vpop.f32.mrb[3].mxu0  ;;  %v2927_v38 = vand.u32 4294901760, %v154_v51 }
 0x13f   :  { %2513 = vmatmul.mubr.f32.gmra.mrb[30].mxu0 %v6198_v31  ;;  %v3498_v7 = vadd.f32 %v3497_v11, %v3496_v13  ;;  %v6802_v31 = vand.u32 4294901760, %v6087_v63  ;;  %v2924_v63 = vand.u32 4294901760, %v153_v14 }
 0x140   :  { %4730 = vmatpush3.bf16.msra.mxu0 %v4729_v15  ;;  %2798 = vmatprep.mubr.f32.mxu0 %v6788_v61  ;;  %v6380_v11 = vsub.f32 %v154_v51, %v2927_v38 }
 0x141   :  { %4722 = vmatpush3.bf16.msra.mxu1 %v6223_v17  ;;  %4732 = vmatprep.subr.bf16.mxu0 %v4731_v27  ;;  %v293_v24 = vadd.f32 %v3498_v7, %v3458_v20  ;;  %v6794_v20 = vand.u32 4294901760, %v6173_v25  ;;  %v6800_v25 = vand.u32 4294901760, %v6068_v19  ;;  %v6804_v19 = vand.u32 4294901760, %v6770_v46  ;;  %v56_v27 = vld [vmem:[#allocation2 + $0x68] sm:$0xff] }
 0x142   :  { %4756 = vmatprep.subr.bf16.mxu1 %v5909_v21  ;;  %v6795_v21 = vand.u32 4294901760, %v6031_v12  ;;  %v6809_v46 = vand.u32 4294901760, %v6155_v33  ;;  %v6812_v33 = vand.u32 4294901760, %v6811_v3 }
 0x143   :  { %v532_v26 = vadd.f32 %v3536_v32, %v293_v24  ;;  %v4743_v12 = vpack.c.bf16 %v6801_v4, %v6800_v25  ;;  %v6378_v32 = vsub.f32 %v153_v14, %v2924_v63  ;;  %v4787_v24 = vpack.c.bf16 %v2927_v38, %v2924_v63 }
 0x144   :  { %2621 = vmatmul.mubr.f32.vlgmr.msra.gmra.mrb[28].mxu1 %v6791_v8  ;;  %4734 = vmatpush3.bf16.msra.mxu0 %v4733_v62  ;;  %v4739_v0 = vpack.c.bf16 %v6796_v29, %v6795_v21  ;;  %v4753_v47 = vpack.c.bf16 %v6812_v33, %v6810_v52  ;;  %v167_v62 = vsel %vm162_vm0, %v56_v27, 0  ;;  %v6813_v21 = vld [vmem:[#allocation27_spill] sm:$0xff] }
 0x145   :  { %4758 = vmatpush3.bf16.msra.mxu1 %v6764_v42  ;;  %2628 = vmatprep.mubr.f32.mxu1 %v6794_v20  ;;  %v4741_v42 = vpack.c.bf16 %v6799_v18, %v6798_v1 }
 0x146   :  { %4736 = vmatprep.subr.bf16.mxu0 %v4735_v50  ;;  %4760 = vmatprep.subr.bf16.mxu1 %v6765_v5  ;;  %v4745_v5 = vpack.c.bf16 %v6803_v39, %v6802_v31  ;;  %v3000_v50 = vand.u32 4294901760, %v167_v62 }
 0x148   :  { %2632 = vmatmul.mubr.f32.gmra.mrb[30].mxu1 %v6797_v10  ;;  %4738 = vmatpush3.bf16.msra.mxu0 %v4737_v34 }
 0x149   :  { %4762 = vmatpush3.bf16.msra.mxu1 %v6766_v40  ;;  %4740 = vmatprep.subr.bf16.mxu0 %v4739_v0  ;;  %v4747_v40 = vpack.c.bf16 %v6805_v59, %v6804_v19  ;;  %v6814_v0 = vld [vmem:[#allocation26_spill] sm:$0xff] }
 0x14a   :  { %4764 = vmatprep.subr.bf16.mxu1 %v6767_v30  ;;  %2909 = vmatprep.mubr.f32.mxu1 %v6788_v61  ;;  %v49_v30 = vld [vmem:[#allocation2 + $0x30] sm:$0xff] }
 0x14b   :  { %v164_v13 = vsel %vm162_vm0, %v49_v30, 0 }
 0x14c   :  { %4742 = vmatpush3.bf16.msra.mxu0 %v4741_v42  ;;  %v2990_v61 = vand.u32 4294901760, %v164_v13  ;;  %v6815_v42 = vld [vmem:[#allocation28_spill] sm:$0xff] }
 0x14d   :  { %4766 = vmatpush3.bf16.msra.mxu1 %v6769_v36  ;;  %4744 = vmatprep.subr.bf16.mxu0 %v4743_v12  ;;  %v6807_v36 = vand.u32 4294901760, %v6127_v44 }
 0x14e   :  { %v3569_v28 = vpop.f32.mrb[4].mxu0  ;;  %4768 = vmatprep.subr.bf16.mxu1 %v6771_v35  ;;  %v4751_v35 = vpack.c.bf16 %v6809_v46, %v6808_v45  ;;  %v2991_v8 = vsub.f32 %v164_v13, %v2990_v61 }
 0x14f   :  { %v3570_v15 = vpop.f32.mrb[5].mxu0  ;;  %v4749_v53 = vpack.c.bf16 %v6807_v36, %v6806_v55 }
 0x150   :  { %v3571_v43 = vadd.f32 %v3570_v15, %v3569_v28  ;;  %4746 = vmatpush3.bf16.msra.mxu0 %v4745_v5  ;;  %v2992_v10 = vand.u32 4294901760, %v2991_v8 }
 0x151   :  { %4770 = vmatpush3.bf16.msra.mxu1 %v6772_v9  ;;  %4748 = vmatprep.subr.bf16.mxu0 %v4747_v40 }
 0x152   :  { %v670_v56 = vadd.f32 %v3571_v43, %v6305_v23  ;;  %4772 = vmatprep.subr.bf16.mxu1 %v6773_v16  ;;  %v3572_v44 = vpop.f32.mrb[6].mxu0  ;;  %v3013_v23 = vand.u32 4294901760, %v6378_v32  ;;  %v3020_v16 = vand.u32 4294901760, %v6380_v11  ;;  %v2993_v4 = vsub.f32 %v2991_v8, %v2992_v10 }
 0x153   :  { %v3573_v7 = vpop.f32.mrb[7].mxu0 }
 0x154   :  { %4750 = vmatpush3.bf16.msra.mxu0 %v4749_v53  ;;  %v3574_v9 = vadd.f32 %v3573_v7, %v3572_v44  ;;  %v4803_v60 = vpack.c.bf16 %v3020_v16, %v3013_v23  ;;  %v3021_v34 = vsub.f32 %v6380_v11, %v3020_v16 }
 0x155   :  { %4774 = vmatpush3.bf16.msra.mxu1 %v6774_v2  ;;  %4752 = vmatprep.subr.bf16.mxu0 %v4751_v35  ;;  %v3014_v2 = vsub.f32 %v6378_v32, %v3013_v23 }
 0x156   :  { %v679_v54 = vadd.f32 %v3574_v9, %v532_v26  ;;  %4776 = vmatprep.subr.bf16.mxu1 %v6777_v49  ;;  %v3001_v49 = vsub.f32 %v167_v62, %v3000_v50 }
 0x157   :  { %v3607_v6 = vpop.f32.mrb[4].mxu1 }
 0x158   :  { %v3608_v57 = vpop.f32.mrb[5].mxu1  ;;  %4754 = vmatpush3.bf16.msra.mxu0 %v4753_v47  ;;  %v3002_v25 = vand.u32 4294901760, %v3001_v49 }
 0x159   :  { %v3609_v48 = vadd.f32 %v3608_v57, %v3607_v6  ;;  %4778 = vmatpush3.bf16.msra.mxu1 %v6085_v41  ;;  %4800 = vmatprep.subr.bf16.mxu0 %v4787_v24  ;;  %v3015_v41 = vand.u32 4294901760, %v3014_v2 }
 0x15a   :  { %4780 = vmatprep.subr.bf16.mxu1 %v6101_v22  ;;  %v3022_v22 = vand.u32 4294901760, %v3021_v34 }
 0x15b   :  { %v787_v20 = vadd.f32 %v3609_v48, %v670_v56  ;;  %v3610_v26 = vpop.f32.mrb[6].mxu1  ;;  %2800 = vmatmul.mubr.f32.vlgmr.msra.gmra.mrb[32].mxu0 %v6813_v21 }
 0x15c   :  { %v3611_v29 = vpop.f32.mrb[7].mxu1  ;;  %2805 = vmatprep.mubr.f32.mxu0 %v6814_v0  ;;  %4802 = vmatpush3.bf16.msra.mxu0 %v4787_v24  ;;  %v4791_v12 = vpack.c.bf16 %v3022_v22, %v3015_v41 }
 0x15d   :  { %v3612_v1 = vadd.f32 %v3611_v29, %v3610_v26  ;;  %4782 = vmatpush3.bf16.msra.mxu1 %v6117_v37  ;;  %4804 = vmatprep.subr.bf16.mxu0 %v4803_v60  ;;  %v3003_v37 = vsub.f32 %v3001_v49, %v3002_v25 }
 0x15e   :  { %4784 = vmatprep.subr.bf16.mxu1 %v6194_v58  ;;  %v2994_v58 = vand.u32 4294901760, %v2993_v4 }
 0x15f   :  { %v798_v18 = vadd.f32 %v3612_v1, %v679_v54  ;;  %2807 = vmatmul.mubr.f32.gmra.mrb[34].mxu0 %v6815_v42  ;;  %v3004_v31 = vand.u32 4294901760, %v3003_v37 }
 0x160   :  { %4194 = vmatprep.mubr.f32.mxu0 %v2992_v10 }
 0x161   :  { %4786 = vmatpush3.bf16.msra.mxu1 %v6223_v17  ;;  %v4795_v17 = vpack.c.bf16 %v6380_v11, %v6378_v32 }
 0x162   :  { %4788 = vmatprep.subr.bf16.mxu1 %v4787_v24 }
 0x163   :  { %4195 = vmatmul.mubr.f32.vlgmr.msra.gmra.mrb[36].mxu0 %v3002_v25 }
 0x164   :  { %2911 = vmatmul.mubr.f32.vlgmr.msra.gmra.mrb[32].mxu1 %v6813_v21  ;;  %4806 = vmatpush3.bf16.msra.mxu0 %v4803_v60 }
 0x165   :  { %4790 = vmatpush3.bf16.msra.mxu1 %v4787_v24  ;;  %2916 = vmatprep.mubr.f32.mxu1 %v6814_v0 }
 0x166   :  { %4201 = vmatprep.mubr.f32.mxu0 %v2990_v61  ;;  %4792 = vmatprep.subr.bf16.mxu1 %v4791_v12 }
 0x167   :  { %4808 = vmatprep.subr.bf16.mxu0 %v4787_v24 }
 0x168   :  { %2918 = vmatmul.mubr.f32.gmra.mrb[34].mxu1 %v6815_v42 }
 0x169   :  { %4173 = vmatprep.mubr.f32.mxu1 %v2994_v58 }
 0x16b   :  { %4202 = vmatmul.mubr.f32.vlgmr.msra.gmra.mrb[36].mxu0 %v3000_v50 }
 0x16c   :  { %4174 = vmatmul.mubr.f32.vlgmr.msra.gmra.mrb[36].mxu1 %v3004_v31  ;;  %4810 = vmatpush3.bf16.msra.mxu0 %v4787_v24 }
 0x16d   :  { %4794 = vmatpush3.bf16.msra.mxu1 %v4791_v12  ;;  %4180 = vmatprep.mubr.f32.mxu1 %v2990_v61 }
 0x16e   :  { %v3645_v39 = vpop.f32.mrb[8].mxu0  ;;  %4208 = vmatprep.mubr.f32.mxu0 %v2990_v61  ;;  %4796 = vmatprep.subr.bf16.mxu1 %v4795_v17 }
 0x16f   :  { %v3646_v5 = vpop.f32.mrb[9].mxu0 }
 0x170   :  { %v3647_v14 = vadd.f32 %v3646_v5, %v3645_v39 }
 0x172   :  { %v966_v51 = vadd.f32 %v3647_v14, %v787_v20  ;;  %v3648_v19 = vpop.f32.mrb[10].mxu0 }
 0x173   :  { %v3649_v59 = vpop.f32.mrb[11].mxu0  ;;  %4209 = vmatmul.mubr.f32.vlgmr.msra.gmra.mrb[36].mxu0 %v3000_v50 }
 0x174   :  { %v3650_v40 = vadd.f32 %v3649_v59, %v3648_v19  ;;  %4181 = vmatmul.mubr.f32.vlgmr.msra.gmra.mrb[36].mxu1 %v3000_v50 }
 0x175   :  { %4798 = vmatpush3.bf16.msra.mxu1 %v4795_v17  ;;  %4187 = vmatprep.mubr.f32.mxu1 %v2991_v8 }
 0x176   :  { %v973_v28 = vadd.f32 %v3650_v40, %v798_v18 }
 0x177   :  { %v3683_v30 = vpop.f32.mrb[8].mxu1 }
 0x178   :  { %v3684_v15 = vpop.f32.mrb[9].mxu1 }
 0x179   :  { %v3685_v63 = vadd.f32 %v3684_v15, %v3683_v30 }
 0x17b   :  { %v1077_v38 = vadd.f32 %v3685_v63, %v966_v51  ;;  %v3686_v43 = vpop.f32.mrb[10].mxu1 }
 0x17c   :  { %v3687_v55 = vpop.f32.mrb[11].mxu1  ;;  %4188 = vmatmul.mubr.f32.vlgmr.msra.gmra.mrb[36].mxu1 %v3001_v49 }
 0x17d   :  { %v3688_v36 = vadd.f32 %v3687_v55, %v3686_v43 }
 0x17f   :  { %v1084_v53 = vadd.f32 %v3688_v36, %v973_v28 }
 0x18e   :  { %v3721_v45 = vpop.f32.mrb[12].mxu0 }
 0x18f   :  { %v3722_v46 = vpop.f32.mrb[13].mxu0 }
 0x190   :  { %v3723_v35 = vadd.f32 %v3722_v46, %v3721_v45 }
 0x192   :  { %v1196_v27 = vadd.f32 %v3723_v35, %v1077_v38  ;;  %v3724_v13 = vpop.f32.mrb[14].mxu0 }
 0x193   :  { %v3725_v32 = vpop.f32.mrb[15].mxu0 }
 0x194   :  { %v3726_v11 = vadd.f32 %v3725_v32, %v3724_v13 }
 0x196   :  { %v1211_v56 = vadd.f32 %v3726_v11, %v1084_v53 }
 0x197   :  { %v3759_v44 = vpop.f32.mrb[12].mxu1 }
 0x198   :  { %v3760_v7 = vpop.f32.mrb[13].mxu1 }
 0x199   :  { %v3761_v9 = vadd.f32 %v3760_v7, %v3759_v44 }
 0x19b   :  { %v1443_v52 = vadd.f32 %v3761_v9, %v1196_v27  ;;  %v3762_v3 = vpop.f32.mrb[14].mxu1 }
 0x19c   :  { %v3763_v33 = vpop.f32.mrb[15].mxu1 }
 0x19d   :  { %v3764_v47 = vadd.f32 %v3763_v33, %v3762_v3 }
 0x19f   :  { %v1450_v62 = vadd.f32 %v3764_v47, %v1211_v56 }
 0x1ae   :  { %v3797_v61 = vpop.f32.mrb[16].mxu0 }
 0x1af   :  { %v3798_v24 = vpop.f32.mrb[17].mxu0 }
 0x1b0   :  { %v3799_v23 = vadd.f32 %v3798_v24, %v3797_v61 }
 0x1b2   :  { %v1588_v16 = vadd.f32 %v3799_v23, %v1443_v52  ;;  %v3800_v54 = vpop.f32.mrb[18].mxu0 }
 0x1b3   :  { %v3801_v6 = vpop.f32.mrb[19].mxu0 }
 0x1b4   :  { %v3802_v50 = vadd.f32 %v3801_v6, %v3800_v54 }
 0x1b6   :  { %v1597_v57 = vadd.f32 %v3802_v50, %v1450_v62 }
 0x1b7   :  { %v3835_v8 = vpop.f32.mrb[16].mxu1 }
 0x1b8   :  { %v3836_v48 = vpop.f32.mrb[17].mxu1 }
 0x1b9   :  { %v3837_v60 = vadd.f32 %v3836_v48, %v3835_v8 }
 0x1bb   :  { %v1705_v2 = vadd.f32 %v3837_v60, %v1588_v16  ;;  %v3838_v34 = vpop.f32.mrb[18].mxu1 }
 0x1bc   :  { %v3839_v20 = vpop.f32.mrb[19].mxu1 }
 0x1bd   :  { %v3840_v26 = vadd.f32 %v3839_v20, %v3838_v34 }
 0x1bf   :  { %v1716_v21 = vadd.f32 %v3840_v26, %v1597_v57 }
 0x1ce   :  { %v3873_v49 = vpop.f32.mrb[20].mxu0 }
 0x1cf   :  { %v3874_v29 = vpop.f32.mrb[21].mxu0 }
 0x1d0   :  { %v3875_v0 = vadd.f32 %v3874_v29, %v3873_v49 }
 0x1d2   :  { %v1884_v10 = vadd.f32 %v3875_v0, %v1705_v2  ;;  %v3876_v1 = vpop.f32.mrb[22].mxu0 }
 0x1d3   :  { %v3877_v41 = vpop.f32.mrb[23].mxu0 }
 0x1d4   :  { %v3878_v22 = vadd.f32 %v3877_v41, %v3876_v1 }
 0x1d6   :  { %v1891_v18 = vadd.f32 %v3878_v22, %v1716_v21 }
 0x1d7   :  { %v3911_v42 = vpop.f32.mrb[20].mxu1 }
 0x1d8   :  { %v3912_v25 = vpop.f32.mrb[21].mxu1 }
 0x1d9   :  { %v3913_v4 = vadd.f32 %v3912_v25, %v3911_v42 }
 0x1db   :  { %v1995_v12 = vadd.f32 %v3913_v4, %v1884_v10  ;;  %v3914_v37 = vpop.f32.mrb[22].mxu1 }
 0x1dc   :  { %v3915_v58 = vpop.f32.mrb[23].mxu1 }
 0x1dd   :  { %v3916_v31 = vadd.f32 %v3915_v58, %v3914_v37 }
 0x1df   :  { %v2002_v17 = vadd.f32 %v3916_v31, %v1891_v18 }
 0x1ee   :  { %v3949_v39 = vpop.f32.mrb[24].mxu0 }
 0x1ef   :  { %v3950_v5 = vpop.f32.mrb[25].mxu0 }
 0x1f0   :  { %v3951_v14 = vadd.f32 %v3950_v5, %v3949_v39 }
 0x1f2   :  { %v2114_v51 = vadd.f32 %v3951_v14, %v1995_v12  ;;  %v3952_v19 = vpop.f32.mrb[26].mxu0 }
 0x1f3   :  { %v3953_v59 = vpop.f32.mrb[27].mxu0 }
 0x1f4   :  { %v3954_v40 = vadd.f32 %v3953_v59, %v3952_v19 }
 0x1f6   :  { %v2129_v28 = vadd.f32 %v3954_v40, %v2002_v17 }
 0x1f7   :  { %v3987_v30 = vpop.f32.mrb[24].mxu1 }
 0x1f8   :  { %v3988_v15 = vpop.f32.mrb[25].mxu1 }
 0x1f9   :  { %v3989_v63 = vadd.f32 %v3988_v15, %v3987_v30 }
 0x1fb   :  { %v2361_v38 = vadd.f32 %v3989_v63, %v2114_v51  ;;  %v3990_v43 = vpop.f32.mrb[26].mxu1 }
 0x1fc   :  { %v3991_v55 = vpop.f32.mrb[27].mxu1 }
 0x1fd   :  { %v3992_v36 = vadd.f32 %v3991_v55, %v3990_v43 }
 0x1ff   :  { %v2368_v53 = vadd.f32 %v3992_v36, %v2129_v28 }
 0x20e   :  { %v4025_v45 = vpop.f32.mrb[28].mxu0 }
 0x20f   :  { %v4026_v46 = vpop.f32.mrb[29].mxu0 }
 0x210   :  { %v4027_v35 = vadd.f32 %v4026_v46, %v4025_v45 }
 0x212   :  { %v2506_v27 = vadd.f32 %v4027_v35, %v2361_v38  ;;  %v4028_v13 = vpop.f32.mrb[30].mxu0 }
 0x213   :  { %v4029_v32 = vpop.f32.mrb[31].mxu0 }
 0x214   :  { %v4030_v11 = vadd.f32 %v4029_v32, %v4028_v13 }
 0x216   :  { %v2515_v56 = vadd.f32 %v4030_v11, %v2368_v53 }
 0x217   :  { %v4063_v44 = vpop.f32.mrb[28].mxu1 }
 0x218   :  { %v4064_v7 = vpop.f32.mrb[29].mxu1 }
 0x219   :  { %v4065_v9 = vadd.f32 %v4064_v7, %v4063_v44 }
 0x21b   :  { %v2623_v52 = vadd.f32 %v4065_v9, %v2506_v27  ;;  %v4066_v3 = vpop.f32.mrb[30].mxu1 }
 0x21c   :  { %v4067_v33 = vpop.f32.mrb[31].mxu1 }
 0x21d   :  { %v4068_v47 = vadd.f32 %v4067_v33, %v4066_v3 }
 0x21f   :  { %v2634_v62 = vadd.f32 %v4068_v47, %v2515_v56 }
 0x22e   :  { %v4101_v61 = vpop.f32.mrb[32].mxu0 }
 0x22f   :  { %v4102_v24 = vpop.f32.mrb[33].mxu0 }
 0x230   :  { %v4103_v23 = vadd.f32 %v4102_v24, %v4101_v61 }
 0x232   :  { %v2802_v16 = vadd.f32 %v4103_v23, %v2623_v52  ;;  %v4104_v54 = vpop.f32.mrb[34].mxu0 }
 0x233   :  { %v4105_v6 = vpop.f32.mrb[35].mxu0 }
 0x234   :  { %v4106_v50 = vadd.f32 %v4105_v6, %v4104_v54 }
 0x236   :  { %v2809_v57 = vadd.f32 %v4106_v50, %v2634_v62 }
 0x237   :  { %v4139_v8 = vpop.f32.mrb[32].mxu1 }
 0x238   :  { %v4140_v48 = vpop.f32.mrb[33].mxu1 }
 0x239   :  { %v4141_v60 = vadd.f32 %v4140_v48, %v4139_v8 }
 0x23b   :  { %v4142_v2 = vpop.f32.mrb[34].mxu1  ;;  %v2913_v34 = vadd.f32 %v4141_v60, %v2802_v16 }
 0x23c   :  { %v4143_v20 = vpop.f32.mrb[35].mxu1 }
 0x23d   :  { %v4144_v26 = vadd.f32 %v4143_v20, %v4142_v2 }
 0x23f   :  { %v2920_v21 = vadd.f32 %v4144_v26, %v2809_v57 }
 0x246   :  { %v4210_v49 = vpop.f32.mrb[36].mxu0 }
 0x247   :  { %v3415_v29 = vpop.f32.mrb[37].mxu0 }
 0x24f   :  { %v4189_v0 = vpop.f32.mrb[36].mxu1 }
 0x250   :  { %v4811_v10 = vadd.f32 %v4189_v0, %v2920_v21  ;;  %v3169_v1 = vpop.f32.mrb[37].mxu1 }
 0x251   :  { %v4813_v41 = vadd.f32 %v3169_v1, %v2913_v34 }
 0x252   :  { %v4812_v22 = vadd.f32 %v4811_v10, %v4210_v49 }
 0x253   :  { %v4814_v18 = vadd.f32 %v4813_v41, %v3415_v29 }
 0x254   :  { %v3460_v42 = vmul.f32 -1.442695, %v4812_v22 }
 0x255   :  { %v3459_v25 = vmul.f32 -1.442695, %v4814_v18 }
 0x256   :  { %4830 = vpow2.f32 %v3460_v42 }
 0x257   :  { %4832 = vpow2.f32 %v3459_v25 }
 0x260   :  { %v4831_v4 = vpop.eup %4830 }
 0x261   :  { %v4833_v12 = vpop.eup %4832  ;;  %v3432_v37 = vadd.f32 1.0, %v4831_v4 }
 0x262   :  { %v3431_v58 = vadd.f32 1.0, %v4833_v12 }
 0x263   :  { %4834 = vrcp.f32 %v3432_v37 }
 0x264   :  { %4836 = vrcp.f32 %v3431_v58 }
 0x26d   :  { %v4835_v31 = vpop.eup %4834 }
 0x26e   :  { %v4837_v17 = vpop.eup %4836  ;;  %3439 = vst.msk [vmem:[#allocation7 + $0x8] sm:$0xff] %vm3437_vm1, %v4835_v31 }
 0x26f   :  { %3438 = vst.msk [vmem:[#allocation7] sm:$0xff] %vm3437_vm1, %v4837_v17 }
 0x270   :  { %4893 = shalt.err (!%p4890_p6)
}
 0x271   :  { %s4894_s17 = scalar_lea.hbm %s6426_s3, 256 }
 0x272   :  { %p4895_p7 = scmp.ne.s32.totalorder %s6426_s3, %s4894_s17  ;;  %p4898_p8 = scmp.lt.u32.totalorder %s4894_s17, %s6426_s3 }
 0x274   :  { %p4900_p9 = pnand %p4898_p8, %p4895_p7 }
 0x276   :  { %4903 = shalt.err (!%p4900_p9)
}
 0x277   :  { %3451 = dma.vmem_to_hbm [thread:$0]  %s3446_s13, 256, %s6426_s3, [#allocation4], %s4914_s0, %s4914_s0, %s4915_s9  }
 0x278   :  { %4908 = dma.done.wait [#allocation4], 256  }
 0x279   :  { %4909 = vsyncadd [#allocation4], 4294967040 }
 0x27a   :  { %3455 = vsyncpa [#allocation3], 1 }
 0x27b   :  { %3456 = vsyncpa [#allocation6], 1 }
 0x27c   :  { %3457 = vsyncpa [#allocation4], 1 }

</bundles_post_ra>
